<compile_context>
chip_gen: v7x
topology: tpu7x:2x2x1
jax: 0.10.0
libtpu: 0.0.40
codegen_flags: <defaults>
</compile_context>

<pallas_src>
import math
import functools

import jax
import jax.numpy as jnp
from jax.experimental import pallas as pl
from jax.experimental.pallas import tpu as pltpu


def _gelu_tanh(x):
    # tanh approximation of GELU (== PyTorch F.gelu(approximate='tanh')).
    # TODO(synk): PyTorch's default F.gelu is the exact erf form; swap in an erf-based
    #             gelu if exact parity with the erf variant is required.
    c = math.sqrt(2.0 / math.pi)
    return 0.5 * x * (1.0 + jnp.tanh(c * (x + 0.044715 * (x * x * x))))


def _mmab_kernel(q_ref, k_ref, mask_ref, wq_ref, bq_ref, wkv_ref, bkv_ref,
                 wo_ref, bo_ref, o_ref, o_acc,
                 *, num_heads, dim_v, batch_tile, n_q, n_k):
    # q_ref   : (TB*Nq, dim_Q)   flattened batch tile of queries
    # k_ref   : (TB*Nk, dim_K)   flattened batch tile of keys/values input
    # mask_ref: (TB, Nq, Nk)     f32 0/1 (or weighted) mask
    # wq_ref  : (dim_Q, dim_V), bq_ref: (1, dim_V)
    # wkv_ref : (dim_K, 2*dim_V) = [Wk*1/sqrt(dim_V) | Wv], bkv_ref: (1, 2*dim_V)
    # wo_ref  : (dim_V, dim_V),  bo_ref: (1, dim_V)
    # o_ref   : (TB*Nq, dim_V)
    # o_acc   : VMEM scratch (TB, Nq, dim_V) f32 — per-head outputs land here (no concat)
    H, ds = num_heads, dim_v // num_heads
    TB, Nq, Nk = batch_tile, n_q, n_k

    # One f32 cast per block (keeps casts out of the head loop; bf16 inputs are fine).
    xq = q_ref[...].astype(jnp.float32)                        # (TB*Nq, dim_Q)
    xk = k_ref[...].astype(jnp.float32)                        # (TB*Nk, dim_K)
    mask = mask_ref[...].astype(jnp.float32)                   # (TB, Nq, Nk)

    neg_inf = jnp.float32(-jnp.inf)
    # Additive -inf mask, computed ONCE per block (replaces a per-head select):
    #   non-masked: s*mask + 0 ;  masked: s*1e0*0 + (-inf) = -inf   (s always finite here)
    add_mask = jnp.where(mask == 0.0, neg_inf, 0.0)            # (TB, Nq, Nk)

    # Projections: two wide matmuls over the whole batch tile (M = TB*N).
    q = jnp.dot(xq, wq_ref[...].astype(jnp.float32),
                preferred_element_type=jnp.float32) + bq_ref[...].astype(jnp.float32)
    kv = jnp.dot(xk, wkv_ref[...].astype(jnp.float32),
                 preferred_element_type=jnp.float32) + bkv_ref[...].astype(jnp.float32)
    k_all = kv[:, :dim_v]        # already scaled by 1/sqrt(dim_V) in the wrapper
    v_all = kv[:, dim_v:]

    for h in range(H):           # static unroll over heads (H small)
        lo, hi = h * ds, (h + 1) * ds
        qh = q[:, lo:hi].reshape(TB, Nq, ds)
        kh = k_all[:, lo:hi].reshape(TB, Nk, ds)
        vh = v_all[:, lo:hi].reshape(TB, Nk, ds)

        # scores are pre-scaled (scale folded into Wk); replicate torch's mul + masked_fill
        s = jnp.einsum('bqd,bkd->bqk', qh, kh,
                       preferred_element_type=jnp.float32)     # (TB, Nq, Nk)
        s = s * mask + add_mask

        m = jnp.max(s, axis=-1, keepdims=True)
        m = jnp.where(m == neg_inf, 0.0, m)                    # keep fully-masked rows finite
        p = jnp.exp(s - m)                                     # masked entries -> exp(-inf) = 0
        denom = jnp.sum(p, axis=-1, keepdims=True)             # == 0 only for fully-masked rows
        r = pl.reciprocal(denom, approx=True)                  # EUP slot
        r = r * (2.0 - denom * r)                              # one Newton step -> ~f32 accuracy
        inv = jnp.where(denom > 0.0, r, 0.0)                   # torch's NaN->0 (row of zeros)

        attn = jnp.einsum('bqk,bkd->bqd', p, vh,
                          preferred_element_type=jnp.float32) * inv
        o_acc[:, :, lo:hi] = qh + attn                         # residual with projected query

    o = o_acc[...].reshape(TB * Nq, dim_v)
    proj = jnp.dot(o, wo_ref[...].astype(jnp.float32),
                   preferred_element_type=jnp.float32) + bo_ref[...].astype(jnp.float32)
    out = o + _gelu_tanh(proj)
    o_ref[...] = out.astype(o_ref.dtype)


def _pick_batch_tile(B, bytes_per_batch, budget_bytes=4 * 1024 * 1024, cap=8):
    # Conservative VMEM budget per grid step (fits v7x's 64 MiB / 32 MiB scoped default).
    tb = min(B, cap)
    while tb > 1 and (B % tb != 0 or tb * bytes_per_batch > budget_bytes):
        tb -= 1
    return tb


def mmab_forward(Q, K, mask, Wq, bq, Wk, bk, Wv, bv, Wo, bo, *, num_heads,
                 batch_tile=None):
    B, Nq, dim_q = Q.shape
    Bk, Nk, dim_k = K.shape
    dim_v = Wq.shape[1]
    assert Bk == B and mask.shape == (B, Nq, Nk)
    assert dim_v % num_heads == 0

    if batch_tile is None:
        bytes_per_batch = 4 * 2 * (Nq * dim_q + Nk * dim_k + Nq * Nk + 2 * Nq * dim_v)
        batch_tile = _pick_batch_tile(B, bytes_per_batch)
    TB = batch_tile
    assert B % TB == 0

    # Host-side (free) prep: fuse [Wk | Wv] into one operand and fold the 1/sqrt(dim_V)
    # score scale into the K half so the kernel never scales scores/queries.
    scale = 1.0 / math.sqrt(dim_v)
    Wkv = jnp.concatenate([Wk * scale, Wv], axis=1)            # (dim_K, 2*dim_V)
    bkv = jnp.concatenate([bk * scale, bv], axis=1)            # (1, 2*dim_V)

    # Flatten batch into the row dim so the projection matmuls have M = TB*N per step.
    Qf = Q.reshape(B * Nq, dim_q)
    Kf = K.reshape(B * Nk, dim_k)
    maskf = mask.astype(jnp.float32)

    kernel = functools.partial(_mmab_kernel, num_heads=num_heads, dim_v=dim_v,
                               batch_tile=TB, n_q=Nq, n_k=Nk)

    out = pl.pallas_call(
        kernel,
        out_shape=jax.ShapeDtypeStruct((B * Nq, dim_v), Q.dtype),
        grid_spec=pltpu.PrefetchScalarGridSpec(
            num_scalar_prefetch=0,
            grid=(B // TB,),
            in_specs=[
                pl.BlockSpec((TB * Nq, dim_q), lambda b: (b, 0)),    # Q rows of this tile
                pl.BlockSpec((TB * Nk, dim_k), lambda b: (b, 0)),    # K rows of this tile
                pl.BlockSpec((TB, Nq, Nk), lambda b: (b, 0, 0)),     # mask
                pl.BlockSpec((dim_q, dim_v), lambda b: (0, 0)),      # Wq
                pl.BlockSpec((1, dim_v), lambda b: (0, 0)),          # bq
                pl.BlockSpec((dim_k, 2 * dim_v), lambda b: (0, 0)),  # [Wk*scale | Wv]
                pl.BlockSpec((1, 2 * dim_v), lambda b: (0, 0)),      # [bk*scale | bv]
                pl.BlockSpec((dim_v, dim_v), lambda b: (0, 0)),      # Wo
                pl.BlockSpec((1, dim_v), lambda b: (0, 0)),          # bo
            ],
            out_specs=pl.BlockSpec((TB * Nq, dim_v), lambda b: (b, 0)),
            scratch_shapes=[pltpu.VMEM((TB, Nq, dim_v), jnp.float32)],
        ),
        compiler_params=pltpu.CompilerParams(
            dimension_semantics=("parallel",),
            vmem_limit_bytes=32 * 1024 * 1024,
        ),
    )(Qf, Kf, maskf, Wq, bq, Wkv, bkv, Wo, bo)
    return out.reshape(B, Nq, dim_v)


def _reference(Q, K, mask, Wq, bq, Wk, bk, Wv, bv, Wo, bo, num_heads):
    """Pure-JAX reference mirroring the PyTorch MMAB forward (ln=False)."""
    dim_v = Wq.shape[1]
    Qp = Q @ Wq + bq[0]
    Kp = K @ Wk + bk[0]
    Vp = K @ Wv + bv[0]
    split = lambda t: jnp.concatenate(jnp.split(t, num_heads, axis=2), axis=0)
    Q_, K_, V_ = split(Qp), split(Kp), split(Vp)
    stacked_mask = jnp.concatenate([mask] * num_heads, axis=0)   # == reshape(stack([mask]*H,0))
    A_unreg = jnp.einsum('gqd,gkd->gqk', Q_, K_) / math.sqrt(dim_v) * stacked_mask
    A_unreg = jnp.where(stacked_mask == 0, -jnp.inf, A_unreg)
    m = jnp.max(A_unreg, axis=2, keepdims=True)
    e = jnp.exp(A_unreg - m)
    A = e / jnp.sum(e, axis=2, keepdims=True)
    A = jnp.where(jnp.isnan(A), 0.0, A)                          # torch's NaN -> 0
    O = Q_ + jnp.einsum('gqk,gkd->gqd', A, V_)
    O = jnp.concatenate(jnp.split(O, num_heads, axis=0), axis=2)
    O = O + _gelu_tanh(O @ Wo + bo[0])
    return O


if __name__ == "__main__":
    B, Nq, Nk = 2, 8, 16
    dim_q = dim_k = dim_v = 32
    num_heads = 4

    key = jax.random.PRNGKey(0)
    kq_in, kk_in, kwq, kbq, kwk, kbk, kwv, kbv, kwo, kbo = jax.random.split(key, 10)

    Q = jax.random.normal(kq_in, (B, Nq, dim_q), dtype=jnp.float32)
    K = jax.random.normal(kk_in, (B, Nk, dim_k), dtype=jnp.float32)

    # key-padding-style mask (B, Nq, Nk); one query row is fully masked to exercise the
    # softmax-NaN -> 0 path of the PyTorch module.
    lengths = jnp.array([Nk, 11])
    mask = (jnp.arange(Nk)[None, None, :] < lengths[:, None, None]).astype(jnp.float32)
    mask = jnp.broadcast_to(mask, (B, Nq, Nk))
    mask = mask.at[1, 5, :].set(0.0)

    # Linear weights stored (in_dim, out_dim); biases stored (1, dim) for a 2D TPU layout.
    def lin_init(kw, kb, fan_in, fan_out):
        lim = 1.0 / math.sqrt(fan_in)
        W = jax.random.uniform(kw, (fan_in, fan_out), minval=-lim, maxval=lim,
                               dtype=jnp.float32)
        b = jax.random.uniform(kb, (1, fan_out), minval=-lim, maxval=lim,
                               dtype=jnp.float32)
        return W, b

    Wq, bq = lin_init(kwq, kbq, dim_q, dim_v)
    Wk, bk = lin_init(kwk, kbk, dim_k, dim_v)
    Wv, bv = lin_init(kwv, kbv, dim_k, dim_v)
    Wo, bo = lin_init(kwo, kbo, dim_v, dim_v)

    out = mmab_forward(Q, K, mask, Wq, bq, Wk, bk, Wv, bv, Wo, bo, num_heads=num_heads)
    out = jax.block_until_ready(out)

    ref = _reference(Q, K, mask, Wq, bq, Wk, bk, Wv, bv, Wo, bo, num_heads)
    assert out.shape == (B, Nq, dim_v)
    # tolerance covers the EUP approximate reciprocal (+ Newton refinement) in the kernel
    assert jnp.allclose(out, ref, atol=1e-4, rtol=1e-4), (
        f"mismatch vs pure-JAX reference: max abs err "
        f"{float(jnp.max(jnp.abs(out - ref)))}")

    print("KERNEL_OK")
</pallas_src>

<mosaic_0001>
module attributes {stable_mosaic.version = 11 : i64} {
  func.func @_mmab_kernel(%arg0: i32, %arg1: memref<16x32xf32, #tpu.memory_space<vmem>>, %arg2: memref<32x32xf32, #tpu.memory_space<vmem>>, %arg3: memref<2x8x16xf32, #tpu.memory_space<vmem>>, %arg4: memref<32x32xf32, #tpu.memory_space<vmem>>, %arg5: memref<1x32xf32, #tpu.memory_space<vmem>>, %arg6: memref<32x64xf32, #tpu.memory_space<vmem>>, %arg7: memref<1x64xf32, #tpu.memory_space<vmem>>, %arg8: memref<32x32xf32, #tpu.memory_space<vmem>>, %arg9: memref<1x32xf32, #tpu.memory_space<vmem>>, %arg10: memref<16x32xf32, #tpu.memory_space<vmem>>, %arg11: memref<2x8x32xf32, #tpu.memory_space<vmem>>) attributes {dimension_semantics = [#tpu.dimension_semantics<parallel>], iteration_bounds = array<i64: 1>, scalar_prefetch = 0 : i64, scratch_operands = 1 : i64, tpu.core_type = #tpu.core_type<tc>, window_params = [{transform_indices = @transform_0, window_bounds = array<i64: 16, 32>}, {transform_indices = @transform_1, window_bounds = array<i64: 32, 32>}, {transform_indices = @transform_2, window_bounds = array<i64: 2, 8, 16>}, {pipeline_mode = #tpu.pipeline_mode<synchronous>, transform_indices = @transform_3, window_bounds = array<i64: 32, 32>}, {pipeline_mode = #tpu.pipeline_mode<synchronous>, transform_indices = @transform_4, window_bounds = array<i64: 1, 32>}, {pipeline_mode = #tpu.pipeline_mode<synchronous>, transform_indices = @transform_5, window_bounds = array<i64: 32, 64>}, {pipeline_mode = #tpu.pipeline_mode<synchronous>, transform_indices = @transform_6, window_bounds = array<i64: 1, 64>}, {pipeline_mode = #tpu.pipeline_mode<synchronous>, transform_indices = @transform_7, window_bounds = array<i64: 32, 32>}, {pipeline_mode = #tpu.pipeline_mode<synchronous>, transform_indices = @transform_8, window_bounds = array<i64: 1, 32>}, {transform_indices = @transform_9, window_bounds = array<i64: 16, 32>}]} {
    %c0 = arith.constant 0 : index
    %c0_0 = arith.constant 0 : index
    %0 = vector.load %arg1[%c0, %c0_0] : memref<16x32xf32, #tpu.memory_space<vmem>>, vector<16x32xf32>
    %c0_1 = arith.constant 0 : index
    %c0_2 = arith.constant 0 : index
    %1 = vector.load %arg2[%c0_1, %c0_2] : memref<32x32xf32, #tpu.memory_space<vmem>>, vector<32x32xf32>
    %c0_3 = arith.constant 0 : index
    %c0_4 = arith.constant 0 : index
    %c0_5 = arith.constant 0 : index
    %2 = vector.load %arg3[%c0_3, %c0_4, %c0_5] : memref<2x8x16xf32, #tpu.memory_space<vmem>>, vector<2x8x16xf32>
    %cst = arith.constant 0.000000e+00 : f32
    %3 = vector.broadcast %cst : f32 to vector<2x8x16xf32>
    %4 = arith.cmpf oeq, %2, %3 : vector<2x8x16xf32>
    %cst_6 = arith.constant 0xFF800000 : f32
    %cst_7 = arith.constant 0.000000e+00 : f32
    %5 = vector.broadcast %cst_6 : f32 to vector<2x8x16xf32>
    %6 = vector.broadcast %cst_7 : f32 to vector<2x8x16xf32>
    %7 = arith.select %4, %5, %6 : vector<2x8x16xi1>, vector<2x8x16xf32>
    %c0_8 = arith.constant 0 : index
    %c0_9 = arith.constant 0 : index
    %8 = vector.load %arg4[%c0_8, %c0_9] : memref<32x32xf32, #tpu.memory_space<vmem>>, vector<32x32xf32>
    %cst_10 = arith.constant dense<0.000000e+00> : vector<16x32xf32>
    %9 = tpu.matmul %0, %8, %cst_10 {dimension_numbers = #tpu.dot_dimension_numbers<[1], [0], [0], [1], [0, 0, 1, 1], [], []>} : vector<16x32xf32>, vector<32x32xf32>, vector<16x32xf32> -> vector<16x32xf32>
    %c0_11 = arith.constant 0 : index
    %c0_12 = arith.constant 0 : index
    %10 = vector.load %arg5[%c0_11, %c0_12] : memref<1x32xf32, #tpu.memory_space<vmem>>, vector<1x32xf32>
    %11 = vector.broadcast %10 : vector<1x32xf32> to vector<16x32xf32>
    %12 = arith.addf %9, %11 : vector<16x32xf32>
    %c0_13 = arith.constant 0 : index
    %c0_14 = arith.constant 0 : index
    %13 = vector.load %arg6[%c0_13, %c0_14] : memref<32x64xf32, #tpu.memory_space<vmem>>, vector<32x64xf32>
    %cst_15 = arith.constant dense<0.000000e+00> : vector<32x64xf32>
    %14 = tpu.matmul %1, %13, %cst_15 {dimension_numbers = #tpu.dot_dimension_numbers<[1], [0], [0], [1], [0, 0, 1, 1], [], []>} : vector<32x32xf32>, vector<32x64xf32>, vector<32x64xf32> -> vector<32x64xf32>
    %c0_16 = arith.constant 0 : index
    %c0_17 = arith.constant 0 : index
    %15 = vector.load %arg7[%c0_16, %c0_17] : memref<1x64xf32, #tpu.memory_space<vmem>>, vector<1x64xf32>
    %16 = vector.broadcast %15 : vector<1x64xf32> to vector<32x64xf32>
    %17 = arith.addf %14, %16 : vector<32x64xf32>
    %18 = vector.extract_strided_slice %17 {offsets = [0, 0], sizes = [32, 32], strides = [1, 1]} : vector<32x64xf32> to vector<32x32xf32>
    %19 = vector.extract_strided_slice %17 {offsets = [0, 32], sizes = [32, 32], strides = [1, 1]} : vector<32x64xf32> to vector<32x32xf32>
    %20 = vector.extract_strided_slice %12 {offsets = [0, 0], sizes = [16, 8], strides = [1, 1]} : vector<16x32xf32> to vector<16x8xf32>
    %21 = vector.shape_cast %20 : vector<16x8xf32> to vector<2x8x8xf32>
    %22 = vector.extract_strided_slice %18 {offsets = [0, 0], sizes = [32, 8], strides = [1, 1]} : vector<32x32xf32> to vector<32x8xf32>
    %23 = vector.shape_cast %22 : vector<32x8xf32> to vector<2x16x8xf32>
    %24 = vector.extract_strided_slice %19 {offsets = [0, 0], sizes = [32, 8], strides = [1, 1]} : vector<32x32xf32> to vector<32x8xf32>
    %25 = vector.shape_cast %24 : vector<32x8xf32> to vector<2x16x8xf32>
    "tpu.trace_start"() <{level = 10 : i32, message = "bqd,bkd->bqk"}> : () -> ()
    %cst_18 = arith.constant dense<0.000000e+00> : vector<2x8x16xf32>
    %26 = tpu.matmul %21, %23, %cst_18 {dimension_numbers = #tpu.dot_dimension_numbers<[2], [2], [1], [1], [0, 0, 0, 1, 1, 1], [0], [0]>} : vector<2x8x8xf32>, vector<2x16x8xf32>, vector<2x8x16xf32> -> vector<2x8x16xf32>
    "tpu.trace_stop"() : () -> ()
    %27 = arith.mulf %26, %2 : vector<2x8x16xf32>
    %28 = arith.addf %27, %7 : vector<2x8x16xf32>
    %cst_19 = arith.constant dense<0xFF800000> : vector<2x8xf32>
    %29 = vector.multi_reduction <maximumf>, %28, %cst_19 [2] : vector<2x8x16xf32> to vector<2x8xf32>
    %30 = vector.shape_cast %29 : vector<2x8xf32> to vector<2x8x1xf32>
    %cst_20 = arith.constant 0xFF800000 : f32
    %31 = vector.broadcast %cst_20 : f32 to vector<2x8x1xf32>
    %32 = arith.cmpf oeq, %30, %31 : vector<2x8x1xf32>
    %cst_21 = arith.constant 0.000000e+00 : f32
    %33 = vector.broadcast %cst_21 : f32 to vector<2x8x1xf32>
    %34 = arith.select %32, %33, %30 : vector<2x8x1xi1>, vector<2x8x1xf32>
    %35 = vector.broadcast %34 : vector<2x8x1xf32> to vector<2x8x16xf32>
    %36 = arith.subf %28, %35 : vector<2x8x16xf32>
    %37 = math.exp %36 : vector<2x8x16xf32>
    %cst_22 = arith.constant dense<0.000000e+00> : vector<2x8xf32>
    %38 = vector.multi_reduction <add>, %37, %cst_22 [2] : vector<2x8x16xf32> to vector<2x8xf32>
    %39 = vector.shape_cast %38 : vector<2x8xf32> to vector<2x8x1xf32>
    %40 = tpu.reciprocal %39 {approx = true} : vector<2x8x1xf32> -> vector<2x8x1xf32>
    %41 = arith.mulf %39, %40 : vector<2x8x1xf32>
    %cst_23 = arith.constant 2.000000e+00 : f32
    %42 = vector.broadcast %cst_23 : f32 to vector<2x8x1xf32>
    %43 = arith.subf %42, %41 : vector<2x8x1xf32>
    %44 = arith.mulf %40, %43 : vector<2x8x1xf32>
    %cst_24 = arith.constant 0.000000e+00 : f32
    %45 = vector.broadcast %cst_24 : f32 to vector<2x8x1xf32>
    %46 = arith.cmpf ogt, %39, %45 : vector<2x8x1xf32>
    %cst_25 = arith.constant 0.000000e+00 : f32
    %47 = vector.broadcast %cst_25 : f32 to vector<2x8x1xf32>
    %48 = arith.select %46, %44, %47 : vector<2x8x1xi1>, vector<2x8x1xf32>
    "tpu.trace_start"() <{level = 10 : i32, message = "bqk,bkd->bqd"}> : () -> ()
    %cst_26 = arith.constant dense<0.000000e+00> : vector<2x8x8xf32>
    %49 = tpu.matmul %37, %25, %cst_26 {dimension_numbers = #tpu.dot_dimension_numbers<[2], [1], [1], [2], [0, 0, 0, 1, 1, 2], [0], [0]>} : vector<2x8x16xf32>, vector<2x16x8xf32>, vector<2x8x8xf32> -> vector<2x8x8xf32>
    "tpu.trace_stop"() : () -> ()
    %50 = vector.broadcast %48 : vector<2x8x1xf32> to vector<2x8x8xf32>
    %51 = arith.mulf %49, %50 : vector<2x8x8xf32>
    %52 = arith.addf %21, %51 : vector<2x8x8xf32>
    %c0_27 = arith.constant 0 : index
    %c0_28 = arith.constant 0 : index
    %c0_29 = arith.constant 0 : index
    %53 = vector.load %arg11[%c0_27, %c0_28, %c0_29] : memref<2x8x32xf32, #tpu.memory_space<vmem>>, vector<2x8x8xf32>
    tpu.vector_store %arg11[%c0_27, %c0_28, %c0_29], %52 {strides = array<i32>} : memref<2x8x32xf32, #tpu.memory_space<vmem>>, vector<2x8x8xf32>,
    %54 = vector.extract_strided_slice %12 {offsets = [0, 8], sizes = [16, 8], strides = [1, 1]} : vector<16x32xf32> to vector<16x8xf32>
    %55 = vector.shape_cast %54 : vector<16x8xf32> to vector<2x8x8xf32>
    %56 = vector.extract_strided_slice %18 {offsets = [0, 8], sizes = [32, 8], strides = [1, 1]} : vector<32x32xf32> to vector<32x8xf32>
    %57 = vector.shape_cast %56 : vector<32x8xf32> to vector<2x16x8xf32>
    %58 = vector.extract_strided_slice %19 {offsets = [0, 8], sizes = [32, 8], strides = [1, 1]} : vector<32x32xf32> to vector<32x8xf32>
    %59 = vector.shape_cast %58 : vector<32x8xf32> to vector<2x16x8xf32>
    "tpu.trace_start"() <{level = 10 : i32, message = "bqd,bkd->bqk"}> : () -> ()
    %cst_30 = arith.constant dense<0.000000e+00> : vector<2x8x16xf32>
    %60 = tpu.matmul %55, %57, %cst_30 {dimension_numbers = #tpu.dot_dimension_numbers<[2], [2], [1], [1], [0, 0, 0, 1, 1, 1], [0], [0]>} : vector<2x8x8xf32>, vector<2x16x8xf32>, vector<2x8x16xf32> -> vector<2x8x16xf32>
    "tpu.trace_stop"() : () -> ()
    %61 = arith.mulf %60, %2 : vector<2x8x16xf32>
    %62 = arith.addf %61, %7 : vector<2x8x16xf32>
    %cst_31 = arith.constant dense<0xFF800000> : vector<2x8xf32>
    %63 = vector.multi_reduction <maximumf>, %62, %cst_31 [2] : vector<2x8x16xf32> to vector<2x8xf32>
    %64 = vector.shape_cast %63 : vector<2x8xf32> to vector<2x8x1xf32>
    %cst_32 = arith.constant 0xFF800000 : f32
    %65 = vector.broadcast %cst_32 : f32 to vector<2x8x1xf32>
    %66 = arith.cmpf oeq, %64, %65 : vector<2x8x1xf32>
    %cst_33 = arith.constant 0.000000e+00 : f32
    %67 = vector.broadcast %cst_33 : f32 to vector<2x8x1xf32>
    %68 = arith.select %66, %67, %64 : vector<2x8x1xi1>, vector<2x8x1xf32>
    %69 = vector.broadcast %68 : vector<2x8x1xf32> to vector<2x8x16xf32>
    %70 = arith.subf %62, %69 : vector<2x8x16xf32>
    %71 = math.exp %70 : vector<2x8x16xf32>
    %cst_34 = arith.constant dense<0.000000e+00> : vector<2x8xf32>
    %72 = vector.multi_reduction <add>, %71, %cst_34 [2] : vector<2x8x16xf32> to vector<2x8xf32>
    %73 = vector.shape_cast %72 : vector<2x8xf32> to vector<2x8x1xf32>
    %74 = tpu.reciprocal %73 {approx = true} : vector<2x8x1xf32> -> vector<2x8x1xf32>
    %75 = arith.mulf %73, %74 : vector<2x8x1xf32>
    %cst_35 = arith.constant 2.000000e+00 : f32
    %76 = vector.broadcast %cst_35 : f32 to vector<2x8x1xf32>
    %77 = arith.subf %76, %75 : vector<2x8x1xf32>
    %78 = arith.mulf %74, %77 : vector<2x8x1xf32>
    %cst_36 = arith.constant 0.000000e+00 : f32
    %79 = vector.broadcast %cst_36 : f32 to vector<2x8x1xf32>
    %80 = arith.cmpf ogt, %73, %79 : vector<2x8x1xf32>
    %cst_37 = arith.constant 0.000000e+00 : f32
    %81 = vector.broadcast %cst_37 : f32 to vector<2x8x1xf32>
    %82 = arith.select %80, %78, %81 : vector<2x8x1xi1>, vector<2x8x1xf32>
    "tpu.trace_start"() <{level = 10 : i32, message = "bqk,bkd->bqd"}> : () -> ()
    %cst_38 = arith.constant dense<0.000000e+00> : vector<2x8x8xf32>
    %83 = tpu.matmul %71, %59, %cst_38 {dimension_numbers = #tpu.dot_dimension_numbers<[2], [1], [1], [2], [0, 0, 0, 1, 1, 2], [0], [0]>} : vector<2x8x16xf32>, vector<2x16x8xf32>, vector<2x8x8xf32> -> vector<2x8x8xf32>
    "tpu.trace_stop"() : () -> ()
    %84 = vector.broadcast %82 : vector<2x8x1xf32> to vector<2x8x8xf32>
    %85 = arith.mulf %83, %84 : vector<2x8x8xf32>
    %86 = arith.addf %55, %85 : vector<2x8x8xf32>
    %c0_39 = arith.constant 0 : index
    %c0_40 = arith.constant 0 : index
    %c8 = arith.constant 8 : index
    %87 = vector.load %arg11[%c0_39, %c0_40, %c8] : memref<2x8x32xf32, #tpu.memory_space<vmem>>, vector<2x8x8xf32>
    tpu.vector_store %arg11[%c0_39, %c0_40, %c8], %86 {strides = array<i32>} : memref<2x8x32xf32, #tpu.memory_space<vmem>>, vector<2x8x8xf32>,
    %88 = vector.extract_strided_slice %12 {offsets = [0, 16], sizes = [16, 8], strides = [1, 1]} : vector<16x32xf32> to vector<16x8xf32>
    %89 = vector.shape_cast %88 : vector<16x8xf32> to vector<2x8x8xf32>
    %90 = vector.extract_strided_slice %18 {offsets = [0, 16], sizes = [32, 8], strides = [1, 1]} : vector<32x32xf32> to vector<32x8xf32>
    %91 = vector.shape_cast %90 : vector<32x8xf32> to vector<2x16x8xf32>
    %92 = vector.extract_strided_slice %19 {offsets = [0, 16], sizes = [32, 8], strides = [1, 1]} : vector<32x32xf32> to vector<32x8xf32>
    %93 = vector.shape_cast %92 : vector<32x8xf32> to vector<2x16x8xf32>
    "tpu.trace_start"() <{level = 10 : i32, message = "bqd,bkd->bqk"}> : () -> ()
    %cst_41 = arith.constant dense<0.000000e+00> : vector<2x8x16xf32>
    %94 = tpu.matmul %89, %91, %cst_41 {dimension_numbers = #tpu.dot_dimension_numbers<[2], [2], [1], [1], [0, 0, 0, 1, 1, 1], [0], [0]>} : vector<2x8x8xf32>, vector<2x16x8xf32>, vector<2x8x16xf32> -> vector<2x8x16xf32>
    "tpu.trace_stop"() : () -> ()
    %95 = arith.mulf %94, %2 : vector<2x8x16xf32>
    %96 = arith.addf %95, %7 : vector<2x8x16xf32>
    %cst_42 = arith.constant dense<0xFF800000> : vector<2x8xf32>
    %97 = vector.multi_reduction <maximumf>, %96, %cst_42 [2] : vector<2x8x16xf32> to vector<2x8xf32>
    %98 = vector.shape_cast %97 : vector<2x8xf32> to vector<2x8x1xf32>
    %cst_43 = arith.constant 0xFF800000 : f32
    %99 = vector.broadcast %cst_43 : f32 to vector<2x8x1xf32>
    %100 = arith.cmpf oeq, %98, %99 : vector<2x8x1xf32>
    %cst_44 = arith.constant 0.000000e+00 : f32
    %101 = vector.broadcast %cst_44 : f32 to vector<2x8x1xf32>
    %102 = arith.select %100, %101, %98 : vector<2x8x1xi1>, vector<2x8x1xf32>
    %103 = vector.broadcast %102 : vector<2x8x1xf32> to vector<2x8x16xf32>
    %104 = arith.subf %96, %103 : vector<2x8x16xf32>
    %105 = math.exp %104 : vector<2x8x16xf32>
    %cst_45 = arith.constant dense<0.000000e+00> : vector<2x8xf32>
    %106 = vector.multi_reduction <add>, %105, %cst_45 [2] : vector<2x8x16xf32> to vector<2x8xf32>
    %107 = vector.shape_cast %106 : vector<2x8xf32> to vector<2x8x1xf32>
    %108 = tpu.reciprocal %107 {approx = true} : vector<2x8x1xf32> -> vector<2x8x1xf32>
    %109 = arith.mulf %107, %108 : vector<2x8x1xf32>
    %cst_46 = arith.constant 2.000000e+00 : f32
    %110 = vector.broadcast %cst_46 : f32 to vector<2x8x1xf32>
    %111 = arith.subf %110, %109 : vector<2x8x1xf32>
    %112 = arith.mulf %108, %111 : vector<2x8x1xf32>
    %cst_47 = arith.constant 0.000000e+00 : f32
    %113 = vector.broadcast %cst_47 : f32 to vector<2x8x1xf32>
    %114 = arith.cmpf ogt, %107, %113 : vector<2x8x1xf32>
    %cst_48 = arith.constant 0.000000e+00 : f32
    %115 = vector.broadcast %cst_48 : f32 to vector<2x8x1xf32>
    %116 = arith.select %114, %112, %115 : vector<2x8x1xi1>, vector<2x8x1xf32>
    "tpu.trace_start"() <{level = 10 : i32, message = "bqk,bkd->bqd"}> : () -> ()
    %cst_49 = arith.constant dense<0.000000e+00> : vector<2x8x8xf32>
    %117 = tpu.matmul %105, %93, %cst_49 {dimension_numbers = #tpu.dot_dimension_numbers<[2], [1], [1], [2], [0, 0, 0, 1, 1, 2], [0], [0]>} : vector<2x8x16xf32>, vector<2x16x8xf32>, vector<2x8x8xf32> -> vector<2x8x8xf32>
    "tpu.trace_stop"() : () -> ()
    %118 = vector.broadcast %116 : vector<2x8x1xf32> to vector<2x8x8xf32>
    %119 = arith.mulf %117, %118 : vector<2x8x8xf32>
    %120 = arith.addf %89, %119 : vector<2x8x8xf32>
    %c0_50 = arith.constant 0 : index
    %c0_51 = arith.constant 0 : index
    %c16 = arith.constant 16 : index
    %121 = vector.load %arg11[%c0_50, %c0_51, %c16] : memref<2x8x32xf32, #tpu.memory_space<vmem>>, vector<2x8x8xf32>
    tpu.vector_store %arg11[%c0_50, %c0_51, %c16], %120 {strides = array<i32>} : memref<2x8x32xf32, #tpu.memory_space<vmem>>, vector<2x8x8xf32>,
    %122 = vector.extract_strided_slice %12 {offsets = [0, 24], sizes = [16, 8], strides = [1, 1]} : vector<16x32xf32> to vector<16x8xf32>
    %123 = vector.shape_cast %122 : vector<16x8xf32> to vector<2x8x8xf32>
    %124 = vector.extract_strided_slice %18 {offsets = [0, 24], sizes = [32, 8], strides = [1, 1]} : vector<32x32xf32> to vector<32x8xf32>
    %125 = vector.shape_cast %124 : vector<32x8xf32> to vector<2x16x8xf32>
    %126 = vector.extract_strided_slice %19 {offsets = [0, 24], sizes = [32, 8], strides = [1, 1]} : vector<32x32xf32> to vector<32x8xf32>
    %127 = vector.shape_cast %126 : vector<32x8xf32> to vector<2x16x8xf32>
    "tpu.trace_start"() <{level = 10 : i32, message = "bqd,bkd->bqk"}> : () -> ()
    %cst_52 = arith.constant dense<0.000000e+00> : vector<2x8x16xf32>
    %128 = tpu.matmul %123, %125, %cst_52 {dimension_numbers = #tpu.dot_dimension_numbers<[2], [2], [1], [1], [0, 0, 0, 1, 1, 1], [0], [0]>} : vector<2x8x8xf32>, vector<2x16x8xf32>, vector<2x8x16xf32> -> vector<2x8x16xf32>
    "tpu.trace_stop"() : () -> ()
    %129 = arith.mulf %128, %2 : vector<2x8x16xf32>
    %130 = arith.addf %129, %7 : vector<2x8x16xf32>
    %cst_53 = arith.constant dense<0xFF800000> : vector<2x8xf32>
    %131 = vector.multi_reduction <maximumf>, %130, %cst_53 [2] : vector<2x8x16xf32> to vector<2x8xf32>
    %132 = vector.shape_cast %131 : vector<2x8xf32> to vector<2x8x1xf32>
    %cst_54 = arith.constant 0xFF800000 : f32
    %133 = vector.broadcast %cst_54 : f32 to vector<2x8x1xf32>
    %134 = arith.cmpf oeq, %132, %133 : vector<2x8x1xf32>
    %cst_55 = arith.constant 0.000000e+00 : f32
    %135 = vector.broadcast %cst_55 : f32 to vector<2x8x1xf32>
    %136 = arith.select %134, %135, %132 : vector<2x8x1xi1>, vector<2x8x1xf32>
    %137 = vector.broadcast %136 : vector<2x8x1xf32> to vector<2x8x16xf32>
    %138 = arith.subf %130, %137 : vector<2x8x16xf32>
    %139 = math.exp %138 : vector<2x8x16xf32>
    %cst_56 = arith.constant dense<0.000000e+00> : vector<2x8xf32>
    %140 = vector.multi_reduction <add>, %139, %cst_56 [2] : vector<2x8x16xf32> to vector<2x8xf32>
    %141 = vector.shape_cast %140 : vector<2x8xf32> to vector<2x8x1xf32>
    %142 = tpu.reciprocal %141 {approx = true} : vector<2x8x1xf32> -> vector<2x8x1xf32>
    %143 = arith.mulf %141, %142 : vector<2x8x1xf32>
    %cst_57 = arith.constant 2.000000e+00 : f32
    %144 = vector.broadcast %cst_57 : f32 to vector<2x8x1xf32>
    %145 = arith.subf %144, %143 : vector<2x8x1xf32>
    %146 = arith.mulf %142, %145 : vector<2x8x1xf32>
    %cst_58 = arith.constant 0.000000e+00 : f32
    %147 = vector.broadcast %cst_58 : f32 to vector<2x8x1xf32>
    %148 = arith.cmpf ogt, %141, %147 : vector<2x8x1xf32>
    %cst_59 = arith.constant 0.000000e+00 : f32
    %149 = vector.broadcast %cst_59 : f32 to vector<2x8x1xf32>
    %150 = arith.select %148, %146, %149 : vector<2x8x1xi1>, vector<2x8x1xf32>
    "tpu.trace_start"() <{level = 10 : i32, message = "bqk,bkd->bqd"}> : () -> ()
    %cst_60 = arith.constant dense<0.000000e+00> : vector<2x8x8xf32>
    %151 = tpu.matmul %139, %127, %cst_60 {dimension_numbers = #tpu.dot_dimension_numbers<[2], [1], [1], [2], [0, 0, 0, 1, 1, 2], [0], [0]>} : vector<2x8x16xf32>, vector<2x16x8xf32>, vector<2x8x8xf32> -> vector<2x8x8xf32>
    "tpu.trace_stop"() : () -> ()
    %152 = vector.broadcast %150 : vector<2x8x1xf32> to vector<2x8x8xf32>
    %153 = arith.mulf %151, %152 : vector<2x8x8xf32>
    %154 = arith.addf %123, %153 : vector<2x8x8xf32>
    %c0_61 = arith.constant 0 : index
    %c0_62 = arith.constant 0 : index
    %c24 = arith.constant 24 : index
    %155 = vector.load %arg11[%c0_61, %c0_62, %c24] : memref<2x8x32xf32, #tpu.memory_space<vmem>>, vector<2x8x8xf32>
    tpu.vector_store %arg11[%c0_61, %c0_62, %c24], %154 {strides = array<i32>} : memref<2x8x32xf32, #tpu.memory_space<vmem>>, vector<2x8x8xf32>,
    %c0_63 = arith.constant 0 : index
    %c0_64 = arith.constant 0 : index
    %c0_65 = arith.constant 0 : index
    %156 = vector.load %arg11[%c0_63, %c0_64, %c0_65] : memref<2x8x32xf32, #tpu.memory_space<vmem>>, vector<2x8x32xf32>
    %157 = vector.shape_cast %156 : vector<2x8x32xf32> to vector<16x32xf32>
    %c0_66 = arith.constant 0 : index
    %c0_67 = arith.constant 0 : index
    %158 = vector.load %arg8[%c0_66, %c0_67] : memref<32x32xf32, #tpu.memory_space<vmem>>, vector<32x32xf32>
    %cst_68 = arith.constant dense<0.000000e+00> : vector<16x32xf32>
    %159 = tpu.matmul %157, %158, %cst_68 {dimension_numbers = #tpu.dot_dimension_numbers<[1], [0], [0], [1], [0, 0, 1, 1], [], []>} : vector<16x32xf32>, vector<32x32xf32>, vector<16x32xf32> -> vector<16x32xf32>
    %c0_69 = arith.constant 0 : index
    %c0_70 = arith.constant 0 : index
    %160 = vector.load %arg9[%c0_69, %c0_70] : memref<1x32xf32, #tpu.memory_space<vmem>>, vector<1x32xf32>
    %161 = vector.broadcast %160 : vector<1x32xf32> to vector<16x32xf32>
    %162 = arith.addf %159, %161 : vector<16x32xf32>
    %cst_71 = arith.constant 5.000000e-01 : f32
    %163 = vector.broadcast %cst_71 : f32 to vector<16x32xf32>
    %164 = arith.mulf %163, %162 : vector<16x32xf32>
    %165 = arith.mulf %162, %162 : vector<16x32xf32>
    %166 = arith.mulf %165, %162 : vector<16x32xf32>
    %cst_72 = arith.constant 4.471500e-02 : f32
    %167 = vector.broadcast %cst_72 : f32 to vector<16x32xf32>
    %168 = arith.mulf %167, %166 : vector<16x32xf32>
    %169 = arith.addf %162, %168 : vector<16x32xf32>
    %cst_73 = arith.constant 0.797884583 : f32
    %170 = vector.broadcast %cst_73 : f32 to vector<16x32xf32>
    %171 = arith.mulf %170, %169 : vector<16x32xf32>
    %172 = math.tanh %171 : vector<16x32xf32>
    %cst_74 = arith.constant 1.000000e+00 : f32
    %173 = vector.broadcast %cst_74 : f32 to vector<16x32xf32>
    %174 = arith.addf %173, %172 : vector<16x32xf32>
    %175 = arith.mulf %164, %174 : vector<16x32xf32>
    %176 = arith.addf %157, %175 : vector<16x32xf32>
    %c0_75 = arith.constant 0 : index
    %c0_76 = arith.constant 0 : index
    %177 = vector.load %arg10[%c0_75, %c0_76] : memref<16x32xf32, #tpu.memory_space<vmem>>, vector<16x32xf32>
    tpu.vector_store %arg10[%c0_75, %c0_76], %176 {strides = array<i32>} : memref<16x32xf32, #tpu.memory_space<vmem>>, vector<16x32xf32>,
    return
  }
  func.func @transform_0(%arg0: i32) -> (i32, i32) {
    %c0_i32 = arith.constant 0 : i32
    %c0_i32_0 = arith.constant 0 : i32
    return %arg0, %c0_i32 : i32, i32
  }
  func.func @transform_1(%arg0: i32) -> (i32, i32) {
    %c0_i32 = arith.constant 0 : i32
    %c0_i32_0 = arith.constant 0 : i32
    return %arg0, %c0_i32 : i32, i32
  }
  func.func @transform_2(%arg0: i32) -> (i32, i32, i32) {
    %c0_i32 = arith.constant 0 : i32
    %c0_i32_0 = arith.constant 0 : i32
    %c0_i32_1 = arith.constant 0 : i32
    return %arg0, %c0_i32, %c0_i32_0 : i32, i32, i32
  }
  func.func @transform_3(%arg0: i32) -> (i32, i32) {
    %c0_i32 = arith.constant 0 : i32
    %c0_i32_0 = arith.constant 0 : i32
    %c0_i32_1 = arith.constant 0 : i32
    return %c0_i32, %c0_i32_0 : i32, i32
  }
  func.func @transform_4(%arg0: i32) -> (i32, i32) {
    %c0_i32 = arith.constant 0 : i32
    %c0_i32_0 = arith.constant 0 : i32
    %c0_i32_1 = arith.constant 0 : i32
    return %c0_i32, %c0_i32_0 : i32, i32
  }
  func.func @transform_5(%arg0: i32) -> (i32, i32) {
    %c0_i32 = arith.constant 0 : i32
    %c0_i32_0 = arith.constant 0 : i32
    %c0_i32_1 = arith.constant 0 : i32
    return %c0_i32, %c0_i32_0 : i32, i32
  }
  func.func @transform_6(%arg0: i32) -> (i32, i32) {
    %c0_i32 = arith.constant 0 : i32
    %c0_i32_0 = arith.constant 0 : i32
    %c0_i32_1 = arith.constant 0 : i32
    return %c0_i32, %c0_i32_0 : i32, i32
  }
  func.func @transform_7(%arg0: i32) -> (i32, i32) {
    %c0_i32 = arith.constant 0 : i32
    %c0_i32_0 = arith.constant 0 : i32
    %c0_i32_1 = arith.constant 0 : i32
    return %c0_i32, %c0_i32_0 : i32, i32
  }
  func.func @transform_8(%arg0: i32) -> (i32, i32) {
    %c0_i32 = arith.constant 0 : i32
    %c0_i32_0 = arith.constant 0 : i32
    %c0_i32_1 = arith.constant 0 : i32
    return %c0_i32, %c0_i32_0 : i32, i32
  }
  func.func @transform_9(%arg0: i32) -> (i32, i32) {
    %c0_i32 = arith.constant 0 : i32
    %c0_i32_0 = arith.constant 0 : i32
    return %arg0, %c0_i32 : i32, i32
  }
}

</mosaic_0001>

<bundles_post_ra>
// kernel: tpu_custom_call.1
= control target key start
LH: loop header
LB: loop body
LE: loop exit
PB: predicated region body
PF: predicated region fallthrough
CT: control target
= control target key end

     0   :  { %14 = vsyncpa [#allocation4], 0  ;;  %s3016_s0 = inlined_call_operand.hbm [shape: f32[16,32], index: 0, kind: input, shape index: {}]   ;;  %s3017_s1 = inlined_call_operand.hbm [shape: f32[32,32], index: 1, kind: input, shape index: {}]   ;;  %s3018_s2 = inlined_call_operand.hbm [shape: f32[2,8,16], index: 2, kind: input, shape index: {}]   ;;  %s3019_s3 = inlined_call_operand.hbm [shape: f32[32,32], index: 3, kind: input, shape index: {}]   ;;  %s3020_s4 = inlined_call_operand.vmem [shape: f32[1,32], index: 4, kind: input, shape index: {}]   ;;  %s3021_s5 = inlined_call_operand.hbm [shape: f32[32,64], index: 5, kind: input, shape index: {}]   ;;  %s3022_s6 = inlined_call_operand.vmem [shape: f32[1,64], index: 6, kind: input, shape index: {}]   ;;  %s3023_s7 = inlined_call_operand.hbm [shape: f32[32,32], index: 7, kind: input, shape index: {}]   ;;  %s3024_s8 = inlined_call_operand.vmem [shape: f32[1,32], index: 8, kind: input, shape index: {}]   ;;  %s3025_s9 = inlined_call_operand.hbm [shape: f32[16,32], index: 9, kind: output, shape index: {}]  }
   0x1   :  { %15 = vsyncpa [#allocation7], 0 }
   0x2   :  { %16 = vsyncpa [#allocation10], 0 }
   0x3   :  { %17 = vsyncpa [#allocation13], 0 }
   0x4   :  { %18 = vsyncpa [#allocation5], 0  ;;  %s2581_s30 = smov [#allocation6]   ;;  %s2582_s11 = smov [#allocation9]  }
   0x5   :  { %s36_s10 = sshll.u32 %s2581_s30, 4  ;;  %s60_s12 = sshll.u32 %s2582_s11, 4  ;;  %s37_s10 = int_to_ptr.vmem [resolvable:$true] %s36_s10  ;;  %s2652_s12 = int_to_ptr.vmem [resolvable:$true] %s60_s12 }
   0x6   :  { %s2417_s15 = scalar_lea.hbm %s3017_s1, 512 }
   0x7   :  { %p2418_p0 = scmp.ne.s32.totalorder %s3017_s1, %s2417_s15  ;;  %p2421_p1 = scmp.lt.u32.totalorder %s2417_s15, %s3017_s1 }
   0x9   :  { %p2423_p2 = pnand %p2421_p1, %p2418_p0 }
   0xb   :  { %2426 = shalt.err (!%p2423_p2)
}
   0xc   :  { %s2427_s20 = scalar_lea.vmem %s37_s10, 512  ;;  %p2432_p4 = scmp.lt.s32.totalorder %s37_s10, %s37_s10 }
   0xd   :  { %p2428_p3 = scmp.ne.s32.totalorder %s37_s10, %s2427_s20  ;;  %p2433_p5 = scmp.lt.s32.totalorder %s2427_s20, %s2427_s20 }
   0xf   :  { %p2434_p6 = por %p2433_p5, %p2432_p4 }
  0x11   :  { %p2435_p7 = pnand %p2434_p6, %p2428_p3 }
  0x13   :  { %2438 = shalt.err (!%p2435_p7)
}
  0x14   :  { %s2583_s21 = smov 128   ;;  %s2584_s22 = smov 8  }
  0x15   :  { %42 = dma.hbm_to_vmem [thread:$0]  %s3017_s1, 512, %s37_s10, [#allocation7], %s2583_s21, %s2583_s21, %s2584_s22  }
  0x16   :  { %s2439_s27 = scalar_lea.hbm %s3019_s3, 512 }
  0x17   :  { %p2440_p8 = scmp.ne.s32.totalorder %s3019_s3, %s2439_s27  ;;  %p2443_p9 = scmp.lt.u32.totalorder %s2439_s27, %s3019_s3 }
  0x19   :  { %p2445_p10 = pnand %p2443_p9, %p2440_p8 }
  0x1b   :  { %2448 = shalt.err (!%p2445_p10)
}
  0x1c   :  { %s2449_s13 = scalar_lea.vmem %s2652_s12, 512  ;;  %p2454_p12 = scmp.lt.s32.totalorder %s2652_s12, %s2652_s12 }
  0x1d   :  { %p2450_p11 = scmp.ne.s32.totalorder %s2652_s12, %s2449_s13  ;;  %p2455_p13 = scmp.lt.s32.totalorder %s2449_s13, %s2449_s13 }
  0x1f   :  { %p2456_p0 = por %p2455_p13, %p2454_p12 }
  0x21   :  { %p2457_p1 = pnand %p2456_p0, %p2450_p11 }
  0x23   :  { %2460 = shalt.err (!%p2457_p1)
}
  0x24   :  { %66 = dma.hbm_to_vmem [thread:$0]  %s3019_s3, 512, %s2652_s12, [#allocation10], %s2583_s21, %s2583_s21, %s2584_s22  }
  0x25   :  { %s2585_s14 = smov [#allocation3]   ;;  %s2586_s16 = smov [#allocation8]  }
  0x26   :  { %s24_s15 = sshll.u32 %s2585_s14, 4  ;;  %s48_s17 = sshll.u32 %s2586_s16, 4  ;;  %s25_s15 = int_to_ptr.vmem [resolvable:$true] %s24_s15  ;;  %s2689_s17 = int_to_ptr.vmem [resolvable:$true] %s48_s17 }
  0x27   :  { %s2461_s20 = scalar_lea.hbm %s3016_s0, 256 }
  0x28   :  { %p2462_p2 = scmp.ne.s32.totalorder %s3016_s0, %s2461_s20  ;;  %p2465_p3 = scmp.lt.u32.totalorder %s2461_s20, %s3016_s0 }
  0x2a   :  { %p2467_p4 = pnand %p2465_p3, %p2462_p2 }
  0x2c   :  { %2470 = shalt.err (!%p2467_p4)
}
  0x2d   :  { %s2471_s3 = scalar_lea.vmem %s25_s15, 256  ;;  %p2476_p6 = scmp.lt.s32.totalorder %s25_s15, %s25_s15 }
  0x2e   :  { %p2472_p5 = scmp.ne.s32.totalorder %s25_s15, %s2471_s3  ;;  %p2477_p7 = scmp.lt.s32.totalorder %s2471_s3, %s2471_s3 }
  0x30   :  { %p2478_p8 = por %p2477_p7, %p2476_p6 }
  0x32   :  { %p2479_p9 = pnand %p2478_p8, %p2472_p5 }
  0x34   :  { %2482 = shalt.err (!%p2479_p9)
}
  0x35   :  { %30 = dma.hbm_to_vmem [thread:$0]  %s3016_s0, 256, %s25_s15, [#allocation4], %s2583_s21, %s2583_s21, %s2584_s22  }
  0x36   :  { %s2483_s30 = scalar_lea.hbm %s3018_s2, 256 }
  0x37   :  { %p2484_p10 = scmp.ne.s32.totalorder %s3018_s2, %s2483_s30  ;;  %p2487_p11 = scmp.lt.u32.totalorder %s2483_s30, %s3018_s2 }
  0x39   :  { %p2489_p12 = pnand %p2487_p11, %p2484_p10 }
  0x3b   :  { %2492 = shalt.err (!%p2489_p12)
}
  0x3c   :  { %s2493_s14 = scalar_lea.vmem %s2689_s17, 256  ;;  %p2498_p0 = scmp.lt.s32.totalorder %s2689_s17, %s2689_s17 }
  0x3d   :  { %p2494_p13 = scmp.ne.s32.totalorder %s2689_s17, %s2493_s14  ;;  %p2499_p1 = scmp.lt.s32.totalorder %s2493_s14, %s2493_s14 }
  0x3f   :  { %p2500_p2 = por %p2499_p1, %p2498_p0 }
  0x41   :  { %p2501_p3 = pnand %p2500_p2, %p2494_p13 }
  0x43   :  { %2504 = shalt.err (!%p2501_p3)
}
  0x44   :  { %54 = dma.hbm_to_vmem [thread:$0]  %s3018_s2, 256, %s2689_s17, [#allocation7], %s2583_s21, %s2583_s21, %s2584_s22  }
  0x45   :  { %s2587_s16 = smov [#allocation11]   ;;  %s2588_s19 = smov [#allocation12]  }
  0x46   :  { %s74_s18 = sshll.u32 %s2587_s16, 4  ;;  %s88_s20 = sshll.u32 %s2588_s19, 4  ;;  %s75_s18 = int_to_ptr.vmem [resolvable:$true] %s74_s18  ;;  %s2726_s20 = int_to_ptr.vmem [resolvable:$true] %s88_s20 }
  0x47   :  { %s2505_s25 = scalar_lea.hbm %s3021_s5, 512 }
  0x48   :  { %p2506_p4 = scmp.ne.s32.totalorder %s3021_s5, %s2505_s25  ;;  %p2509_p5 = scmp.lt.u32.totalorder %s2505_s25, %s3021_s5 }
  0x4a   :  { %p2511_p6 = pnand %p2509_p5, %p2506_p4 }
  0x4c   :  { %2514 = shalt.err (!%p2511_p6)
}
  0x4d   :  { %s2515_s2 = scalar_lea.vmem %s75_s18, 512  ;;  %p2520_p8 = scmp.lt.s32.totalorder %s75_s18, %s75_s18 }
  0x4e   :  { %p2516_p7 = scmp.ne.s32.totalorder %s75_s18, %s2515_s2  ;;  %p2521_p9 = scmp.lt.s32.totalorder %s2515_s2, %s2515_s2 }
  0x50   :  { %p2522_p10 = por %p2521_p9, %p2520_p8 }
  0x52   :  { %p2523_p11 = pnand %p2522_p10, %p2516_p7 }
  0x54   :  { %2526 = shalt.err (!%p2523_p11)
}
  0x55   :  { %80 = dma.hbm_to_vmem [thread:$0]  %s3021_s5, 512, %s75_s18, [#allocation10], %s2583_s21, %s2583_s21, %s2584_s22  }
  0x56   :  { %s2527_s11 = scalar_lea.hbm %s3023_s7, 512 }
  0x57   :  { %p2528_p12 = scmp.ne.s32.totalorder %s3023_s7, %s2527_s11  ;;  %p2531_p13 = scmp.lt.u32.totalorder %s2527_s11, %s3023_s7 }
  0x59   :  { %p2533_p0 = pnand %p2531_p13, %p2528_p12 }
  0x5b   :  { %2536 = shalt.err (!%p2533_p0)
}
  0x5c   :  { %s2537_s0 = scalar_lea.vmem %s2726_s20, 512  ;;  %p2542_p2 = scmp.lt.s32.totalorder %s2726_s20, %s2726_s20 }
  0x5d   :  { %p2538_p1 = scmp.ne.s32.totalorder %s2726_s20, %s2537_s0  ;;  %p2543_p3 = scmp.lt.s32.totalorder %s2537_s0, %s2537_s0 }
  0x5f   :  { %p2544_p4 = por %p2543_p3, %p2542_p2 }
  0x61   :  { %p2545_p5 = pnand %p2544_p4, %p2538_p1 }
  0x63   :  { %2548 = shalt.err (!%p2545_p5)
}
  0x64   :  { %94 = dma.hbm_to_vmem [thread:$0]  %s3023_s7, 512, %s2726_s20, [#allocation13], %s2583_s21, %s2583_s21, %s2584_s22  }
  0x65   :  { %2571 = dma.done.wait [#allocation4], 256  }
  0x66   :  { %2572 = vsyncadd [#allocation4], 4294967040 }
  0x67   :  { %2573 = dma.done.wait [#allocation7], 768  }
  0x68   :  { %2574 = vsyncadd [#allocation7], 4294966528 }
  0x69   :  { %2575 = dma.done.wait [#allocation10], 1024  }
  0x6a   :  { %2576 = vsyncadd [#allocation10], 4294966272 }
  0x6b   :  { %2577 = dma.done.wait [#allocation13], 512  }
  0x6c   :  { %2578 = vsyncadd [#allocation13], 4294966784  ;;  %vm138_vm0 = vcmask 261120   ;;  %v220_v0 = vld [vmem:[#allocation11] sm:$0xff]  ;;  %v221_v1 = vld [vmem:[#allocation11 + $0x8] sm:$0xff]  ;;  %v2589_v18 = vmov 0.0|0.0  }
  0x6d   :  { %v222_v2 = vld [vmem:[#allocation11 + $0x10] sm:$0xff]  ;;  %v2218_v3 = vpack.c.bf16 %v221_v1, %v220_v0  ;;  %v223_v4 = vld [vmem:[#allocation11 + $0x18] sm:$0xff]  ;;  %v127_v6 = vld [vmem:[#allocation9] sm:$0xff]  ;;  %vm2590_vm1 = vmmov 0   ;;  %v2591_v19 = vmov 0.0   ;;  %vm328_vm2 = vcmask 64512  }
  0x6e   :  { %v117_v5 = vld [vmem:[#allocation6] sm:$0xff]  ;;  %v2222_v7 = vpack.c.bf16 %v223_v4, %v222_v2  ;;  %v128_v8 = vld [vmem:[#allocation9 + $0x8] sm:$0xff]  ;;  %v130_v11 = vld [vmem:[#allocation9 + $0x18] sm:$0xff]  ;;  %s2594_s20 = smov 88   ;;  %vm491_vm6 = vcmask 130048   ;;  %s2595_s23 = smov 112  }
  0x6f   :  { %2081 = vmatprep.mubr.msk.f32.mxu1 %vm138_vm0, %v117_v5  ;;  %2219 = vmatprep.subr.bf16.mxu1 %v2218_v3  ;;  %v2210_v9 = vpack.c.bf16 %v128_v8, %v127_v6  ;;  %v129_v10 = vld [vmem:[#allocation9 + $0x10] sm:$0xff]  ;;  %v115_v13 = vld [vmem:[#allocation3] sm:$0xff]  ;;  %v118_v14 = vld [vmem:[#allocation6 + $0x8] sm:$0xff]  ;;  %s2596_s24 = smov 80   ;;  %s2597_s25 = smov 104  }
  0x70   :  { %2221 = vmatpush3.bf16.msra.mxu1 %v2218_v3  ;;  %v2214_v12 = vpack.c.bf16 %v130_v11, %v129_v10  ;;  %2070 = vmatprep.mubr.msk.f32.mxu0 %vm138_vm0, %v115_v13  ;;  %v119_v15 = vld [vmem:[#allocation6 + $0x10] sm:$0xff]  ;;  %v116_v16 = vld [vmem:[#allocation3 + $0x8] sm:$0xff]  ;;  %v1954_v20 = vld [vmem:[%s3022_s6] ss:$0 sm:$0xff]  ;;  %s2592_s6 = smov 96   ;;  %s2598_s26 = smov 72  }
  0x71   :  { %2223 = vmatprep.subr.bf16.mxu1 %v2222_v7  ;;  %2211 = vmatprep.subr.bf16.mxu0 %v2210_v9  ;;  %v120_v17 = vld [vmem:[#allocation6 + $0x18] sm:$0xff]  ;;  %vm2780_vm3 = vmpackc.low %vm328_vm2, %vm328_vm2  ;;  %v1951_v31 = vld [vmem:[%s3020_s4] ss:$0 sm:$0xff]  ;;  %s2593_s4 = smov 120   ;;  %s2599_s3 = smov 16  }
  0x72   :  { %2213 = vmatpush3.bf16.msra.mxu0 %v2210_v9  ;;  %v2820_v43 = vld [vmem:[#allocation8] sm:$0xff]  ;;  %v2823_v44 = vld [vmem:[#allocation8 + $0x8] sm:$0xff]  ;;  %s2600_s12 = smov 24  }
  0x73   :  { %2215 = vmatprep.subr.bf16.mxu0 %v2214_v12  ;;  %vm123_vm4 = vcmp.eq.f32.partialorder %v2820_v43, 0.0  ;;  %vm124_vm5 = vcmp.eq.f32.partialorder %v2823_v44, 0.0 }
  0x74   :  { %2225 = vmatpush3.bf16.msra.mxu1 %v2222_v7  ;;  %v2826_v46 = vsel %vm123_vm4, -inf, %v2591_v19  ;;  %v2832_v51 = vsel %vm124_vm5, -inf, %v2591_v19 }
  0x75   :  { %2230 = vmatprep.subr.bf16.mxu1 %v2589_v18 }
  0x76   :  { %2217 = vmatpush3.bf16.msra.mxu0 %v2214_v12 }
  0x77   :  { %2082 = vmatmul.mubr.msk.f32.vlgmr.msra.gmra.mrb[0].mxu1 %vm138_vm0, %v118_v14  ;;  %2226 = vmatprep.subr.bf16.mxu0 %v2589_v18 }
  0x78   :  { %2084 = vmatprep.mubr.msk.f32.mxu1 %vm138_vm0, %v119_v15 }
  0x79   :  { %2071 = vmatmul.mubr.msk.f32.vlgmr.msra.gmra.mrb[0].mxu0 %vm138_vm0, %v116_v16 }
  0x7a   :  { %2091 = vmatprep.mubr.msk.f32.mxu0 %vm2590_vm1, %v2591_v19 }
  0x7b   :  { %2085 = vmatmul.mubr.msk.f32.gmra.mrb[2].mxu1 %vm138_vm0, %v120_v17 }
  0x7c   :  { %2098 = vmatprep.mubr.msk.f32.mxu1 %vm2590_vm1, %v2591_v19 }
 0x14a   :  { %v2083_v21 = vpop.f32.mrb[0].mxu1 }
 0x14b   :  { %v315_v22 = vadd.f32 %v2083_v21, %v1954_v20  ;;  %v309_v23 = vpop.f32.mrb[1].mxu1 }
 0x14c   :  { %v310_v24 = vadd.f32 %v1954_v20, %v309_v23  ;;  %v2072_v25 = vpop.f32.mrb[0].mxu0 }
 0x14d   :  { %v211_v27 = vpop.f32.mrb[1].mxu0  ;;  %v2807_v38 = vadd.f32 %v2072_v25, %v1951_v31 }
 0x14e   :  { %v2086_v28 = vpop.f32.mrb[2].mxu1  ;;  %v2784_v29 = vpack.i.bf16 %v315_v22, %v310_v24  ;;  %v2227_v30 = vpack.c.bf16 %v315_v22, %v310_v24  ;;  %v2792_v35 = vadd.f32 %v1951_v31, %v211_v27 }
 0x14f   :  { %v325_v32 = vadd.f32 %v2086_v28, %v1954_v20  ;;  %v319_v33 = vpop.f32.mrb[3].mxu1 }
 0x150   :  { %v320_v34 = vadd.f32 %v1954_v20, %v319_v33  ;;  %2312 = vrot.lane.b32.xlu1 %v2784_v29, %s2592_s6  ;;  %2229 = vmatpush3.bf16.xpose.msk.msra.mxu0 %vm2780_vm3, %v2227_v30 }
 0x151   :  { %2240 = vmatprep.subr.bf16.mxu0 %v2589_v18 }
 0x152   :  { %v2231_v36 = vpack.c.bf16 %v325_v32, %v320_v34  ;;  %v2795_v37 = vpack.i.bf16 %v325_v32, %v320_v34 }
 0x154   :  { %2233 = vmatpush3.bf16.xpose.msk.msra.mxu1 %vm2780_vm3, %v2231_v36  ;;  %2317 = vrot.lane.b32.xlu1 %v2795_v37, %s2592_s6 }
 0x155   :  { %2234 = vmatprep.subr.bf16.mxu1 %v2589_v18 }
 0x157   :  { %2092 = vmatmul.mubr.msk.f32.vlgmr.msra.gmra.mrb[2].mxu0 %vm328_vm2, %v2792_v35 }
 0x158   :  { %2327 = vrot.lane.b32.xlu1 %v2795_v37, %s2593_s4  ;;  %2119 = vmatprep.mubr.msk.f32.mxu0 %vm2590_vm1, %v2591_v19 }
 0x15b   :  { %2099 = vmatmul.mubr.msk.f32.vlgmr.msra.gmra.mrb[4].mxu1 %vm328_vm2, %v2807_v38 }
 0x15c   :  { %690 = vrot.lane.b32.xlu1 %v2792_v35, %s2593_s4  ;;  %2105 = vmatprep.mubr.msk.f32.mxu1 %vm2590_vm1, %v2591_v19 }
 0x160   :  { %772 = vrot.lane.b32.xlu1 %v2807_v38, %s2593_s4 }
 0x164   :  { %2332 = vrot.lane.b32.xlu1 %v2784_v29, %s2594_s20 }
 0x1c2   :  { %v2313_v39 = vpop.permute.xlu1 %2312 }
 0x1c3   :  { %v2315_v40 = vunpack.i.h.bf16 %v2313_v39  ;;  %v2314_v41 = vunpack.i.l.bf16 %v2313_v39 }
 0x1c5   :  { %v2235_v42 = vpack.c.bf16 %v2315_v40, %v2314_v41 }
 0x1c6   :  { %v2318_v57 = vpop.permute.xlu1 %2317 }
 0x1c7   :  { %2236 = vmatpush3.bf16.msra.mxu1 %v2235_v42  ;;  %v2320_v10 = vunpack.i.h.bf16 %v2318_v57  ;;  %v2319_v11 = vunpack.i.l.bf16 %v2318_v57 }
 0x1c8   :  { %2237 = vmatprep.subr.bf16.mxu1 %v2589_v18 }
 0x1c9   :  { %v2238_v15 = vpack.c.bf16 %v2320_v10, %v2319_v11 }
 0x1ca   :  { %v2328_v58 = vpop.permute.xlu1 %2327 }
 0x1cb   :  { %v2330_v20 = vunpack.i.h.bf16 %v2328_v58  ;;  %v2329_v21 = vunpack.i.l.bf16 %v2328_v58 }
 0x1cd   :  { %v2245_v22 = vpack.c.bf16 %v2330_v20, %v2329_v21 }
 0x1ce   :  { %v691_v59 = vpop.permute.xlu1 %690 }
 0x1d2   :  { %v773_v1 = vpop.permute.xlu1 %772 }
 0x1d6   :  { %v2333_v9 = vpop.permute.xlu1 %2332 }
 0x1d7   :  { %v2335_v12 = vunpack.i.h.bf16 %v2333_v9  ;;  %v2334_v13 = vunpack.i.l.bf16 %v2333_v9 }
 0x1d9   :  { %v2249_v16 = vpack.c.bf16 %v2335_v12, %v2334_v13 }
 0x22a   :  { %v404_v45 = vpop.f32.mrb[2].mxu0 }
 0x22b   :  { %v487_v47 = vmul.f32 %v404_v45, %v2820_v43  ;;  %v2093_v48 = vpop.f32.mrb[3].mxu0 }
 0x22d   :  { %v489_v49 = vadd.f32 %v487_v47, %v2826_v46 }
 0x22e   :  { %v483_v50 = vpop.f32.mrb[4].mxu1 }
 0x22f   :  { %v488_v52 = vmul.f32 %v483_v50, %v2823_v44  ;;  %v2100_v53 = vpop.f32.mrb[5].mxu1  ;;  %v492_v54 = vsel %vm491_vm6, %v489_v49, -inf }
 0x230   :  { %493 = vmax.xlane.f32.xlu0 %v492_v54 }
 0x231   :  { %v490_v55 = vadd.f32 %v488_v52, %v2832_v51 }
 0x233   :  { %v495_v56 = vsel %vm491_vm6, %v490_v55, -inf }
 0x234   :  { %496 = vmax.xlane.f32.xlu0 %v495_v56 }
 0x24a   :  { %2322 = vrot.lane.b32.xlu0 %v2784_v29, %s2593_s4 }
 0x2bd   :  { %v494_v60 = vpop.xlane.xlu0 %493 }
 0x2be   :  { %vm498_vm7 = vcmp.eq.f32.partialorder %v494_v60, -inf }
 0x2bf   :  { %v500_v61 = vsel %vm498_vm7, 0.0, %v494_v60 }
 0x2c0   :  { %v502_v62 = vsub.f32 %v489_v49, %v500_v61 }
 0x2c1   :  { %v497_v63 = vpop.xlane.xlu0 %496 }
 0x2c2   :  { %v504_v0 = vmul.f32 1.442695, %v502_v62  ;;  %vm499_vm8 = vcmp.eq.f32.partialorder %v497_v63, -inf }
 0x2c3   :  { %v501_v2 = vsel %vm499_vm8, 0.0, %v497_v63  ;;  %vm1437_vm8 = vcmask 195712  }
 0x2c4   :  { %2381 = vpow2.f32 %v504_v0  ;;  %v503_v3 = vsub.f32 %v490_v55, %v501_v2 }
 0x2c5   :  { %v2323_v4 = vpop.permute.xlu0 %2322 }
 0x2c6   :  { %v506_v5 = vmul.f32 1.442695, %v503_v3  ;;  %v2325_v6 = vunpack.i.h.bf16 %v2323_v4  ;;  %v2324_v7 = vunpack.i.l.bf16 %v2323_v4 }
 0x2c8   :  { %2383 = vpow2.f32 %v506_v5  ;;  %v2241_v8 = vpack.c.bf16 %v2325_v6, %v2324_v7 }
 0x2ca   :  { %2243 = vmatpush3.bf16.xpose.msk.msra.mxu0 %vm2780_vm3, %v2241_v8 }
 0x2cb   :  { %2248 = vmatprep.subr.bf16.mxu0 %v2589_v18 }
 0x2ce   :  { %v2843_v14 = vpop.eup %2381 }
 0x2cf   :  { %2106 = vmatmul.mubr.msk.f32.vlgmr.msra.gmra.mrb[6].mxu1 %vm491_vm6, %v2843_v14 }
 0x2d0   :  { %2239 = vmatpush3.bf16.msra.mxu1 %v2238_v15  ;;  %2112 = vmatprep.mubr.msk.f32.mxu1 %vm2590_vm1, %v2591_v19 }
 0x2d1   :  { %2120 = vmatmul.mubr.msk.f32.vlgmr.msra.gmra.mrb[4].mxu0 %vm328_vm2, %v691_v59  ;;  %2244 = vmatprep.subr.bf16.mxu1 %v2589_v18 }
 0x2d2   :  { %v2851_v17 = vpop.eup %2383  ;;  %2250 = vmatpush3.bf16.msra.mxu0 %v2249_v16  ;;  %2133 = vmatprep.mubr.msk.f32.mxu0 %vm2590_vm1, %v2591_v19 }
 0x2d3   :  { %2113 = vmatmul.mubr.msk.f32.vlgmr.msra.gmra.mrb[8].mxu1 %vm491_vm6, %v2851_v17  ;;  %2254 = vmatprep.subr.bf16.mxu0 %v2589_v18 }
 0x2d4   :  { %2126 = vmatprep.mubr.msk.f32.mxu1 %vm2590_vm1, %v2591_v19 }
 0x2d9   :  { %2247 = vmatpush3.bf16.xpose.msk.msra.mxu1 %vm2780_vm3, %v2245_v22 }
 0x2da   :  { %2251 = vmatprep.subr.bf16.mxu1 %v2589_v18 }
 0x2e0   :  { %2127 = vmatmul.mubr.msk.f32.vlgmr.msra.gmra.mrb[10].mxu1 %vm328_vm2, %v773_v1 }
 0x2e1   :  { %2140 = vmatprep.mubr.msk.f32.mxu1 %vm2590_vm1, %v2591_v19 }
 0x3a2   :  { %v2866_v23 = vpop.f32.mrb[6].mxu1 }
 0x3a3   :  { %v2107_v24 = vpop.f32.mrb[7].mxu1 }
 0x3a4   :  { %v768_v25 = vpop.f32.mrb[4].mxu0 }
 0x3a5   :  { %v854_v27 = vmul.f32 %v768_v25, %v2820_v43  ;;  %v2121_v28 = vpop.f32.mrb[5].mxu0 }
 0x3a6   :  { %v2869_v30 = vpop.f32.mrb[8].mxu1 }
 0x3a7   :  { %v2114_v31 = vpop.f32.mrb[9].mxu1  ;;  %v856_v32 = vadd.f32 %v854_v27, %v2826_v46 }
 0x3a9   :  { %v858_v33 = vsel %vm491_vm6, %v856_v32, -inf }
 0x3aa   :  { %859 = vmax.xlane.f32.xlu1 %v858_v33 }
 0x3b3   :  { %v850_v34 = vpop.f32.mrb[10].mxu1 }
 0x3b4   :  { %v855_v36 = vmul.f32 %v850_v34, %v2823_v44  ;;  %v2128_v39 = vpop.f32.mrb[11].mxu1 }
 0x3b6   :  { %v857_v40 = vadd.f32 %v855_v36, %v2832_v51 }
 0x3b8   :  { %v861_v41 = vsel %vm491_vm6, %v857_v40, -inf }
 0x3b9   :  { %862 = vmax.xlane.f32.xlu0 %v861_v41 }
 0x3bb   :  { %2342 = vrot.lane.b32.xlu1 %v2784_v29, %s2595_s23 }
 0x3bf   :  { %2347 = vrot.lane.b32.xlu1 %v2795_v37, %s2595_s23 }
 0x3c3   :  { %1065 = vrot.lane.b32.xlu1 %v2792_v35, %s2595_s23 }
 0x3c7   :  { %2357 = vrot.lane.b32.xlu1 %v2795_v37, %s2596_s24 }
 0x3cf   :  { %2337 = vrot.lane.b32.xlu0 %v2795_v37, %s2594_s20 }
 0x3d3   :  { %1147 = vrot.lane.b32.xlu0 %v2807_v38, %s2595_s23 }
 0x3d7   :  { %2352 = vrot.lane.b32.xlu0 %v2784_v29, %s2596_s24 }
 0x437   :  { %v860_v42 = vpop.xlane.xlu1 %859 }
 0x438   :  { %vm864_vm9 = vcmp.eq.f32.partialorder %v860_v42, -inf }
 0x439   :  { %v866_v45 = vsel %vm864_vm9, 0.0, %v860_v42 }
 0x43a   :  { %v868_v47 = vsub.f32 %v856_v32, %v866_v45 }
 0x43b   :  { %v2343_v49 = vpop.permute.xlu1 %2342 }
 0x43c   :  { %v870_v48 = vmul.f32 1.442695, %v868_v47  ;;  %v2345_v50 = vunpack.i.h.bf16 %v2343_v49  ;;  %v2344_v52 = vunpack.i.l.bf16 %v2343_v49 }
 0x43e   :  { %2385 = vpow2.f32 %v870_v48  ;;  %v2255_v55 = vpack.c.bf16 %v2345_v50, %v2344_v52 }
 0x43f   :  { %v2348_v58 = vpop.permute.xlu1 %2347 }
 0x440   :  { %v2350_v3 = vunpack.i.h.bf16 %v2348_v58  ;;  %v2349_v4 = vunpack.i.l.bf16 %v2348_v58 }
 0x442   :  { %v2259_v9 = vpack.c.bf16 %v2350_v3, %v2349_v4 }
 0x443   :  { %v1066_v1 = vpop.permute.xlu1 %1065 }
 0x446   :  { %v863_v53 = vpop.xlane.xlu0 %862 }
 0x447   :  { %vm865_vm10 = vcmp.eq.f32.partialorder %v863_v53, -inf  ;;  %v2358_v10 = vpop.permute.xlu1 %2357 }
 0x448   :  { %v2884_v54 = vpop.eup %2385  ;;  %v867_v56 = vsel %vm865_vm10, 0.0, %v863_v53  ;;  %v2360_v11 = vunpack.i.h.bf16 %v2358_v10  ;;  %v2359_v12 = vunpack.i.l.bf16 %v2358_v10  ;;  %vm1812_vm10 = vcmask 261312  }
 0x449   :  { %v869_v57 = vsub.f32 %v857_v40, %v867_v56  ;;  %2134 = vmatmul.mubr.msk.f32.vlgmr.msra.gmra.mrb[6].mxu0 %vm491_vm6, %v2884_v54 }
 0x44a   :  { %v2338_v59 = vpop.permute.xlu0 %2337  ;;  %2257 = vmatpush3.bf16.xpose.msk.msra.mxu0 %vm2780_vm3, %v2255_v55  ;;  %2147 = vmatprep.mubr.msk.f32.mxu0 %vm2590_vm1, %v2591_v19  ;;  %v2266_v13 = vpack.c.bf16 %v2360_v11, %v2359_v12 }
 0x44b   :  { %v872_v60 = vmul.f32 1.442695, %v869_v57  ;;  %v2340_v61 = vunpack.i.h.bf16 %v2338_v59  ;;  %v2339_v62 = vunpack.i.l.bf16 %v2338_v59  ;;  %2262 = vmatprep.subr.bf16.mxu0 %v2589_v18 }
 0x44d   :  { %2387 = vpow2.f32 %v872_v60  ;;  %v2252_v63 = vpack.c.bf16 %v2340_v61, %v2339_v62 }
 0x44e   :  { %v1148_v0 = vpop.permute.xlu0 %1147 }
 0x44f   :  { %2253 = vmatpush3.bf16.msra.mxu1 %v2252_v63 }
 0x450   :  { %2258 = vmatprep.subr.bf16.mxu1 %v2589_v18 }
 0x451   :  { %2148 = vmatmul.mubr.msk.f32.vlgmr.msra.gmra.mrb[8].mxu0 %vm328_vm2, %v1066_v1 }
 0x452   :  { %v2353_v2 = vpop.permute.xlu0 %2352  ;;  %2161 = vmatprep.mubr.msk.f32.mxu0 %vm2590_vm1, %v2591_v19 }
 0x453   :  { %v2355_v5 = vunpack.i.h.bf16 %v2353_v2  ;;  %v2354_v6 = vunpack.i.l.bf16 %v2353_v2 }
 0x455   :  { %v2263_v7 = vpack.c.bf16 %v2355_v5, %v2354_v6 }
 0x457   :  { %v2897_v8 = vpop.eup %2387  ;;  %2264 = vmatpush3.bf16.msra.mxu0 %v2263_v7 }
 0x458   :  { %2141 = vmatmul.mubr.msk.f32.vlgmr.msra.gmra.mrb[12].mxu1 %vm491_vm6, %v2897_v8  ;;  %2268 = vmatprep.subr.bf16.mxu0 %v2589_v18 }
 0x459   :  { %2261 = vmatpush3.bf16.xpose.msk.msra.mxu1 %vm2780_vm3, %v2259_v9  ;;  %2154 = vmatprep.mubr.msk.f32.mxu1 %vm2590_vm1, %v2591_v19 }
 0x45a   :  { %2265 = vmatprep.subr.bf16.mxu1 %v2589_v18 }
 0x460   :  { %2155 = vmatmul.mubr.msk.f32.vlgmr.msra.gmra.mrb[14].mxu1 %vm328_vm2, %v1148_v0 }
 0x461   :  { %2267 = vmatpush3.bf16.msra.mxu1 %v2266_v13  ;;  %2168 = vmatprep.mubr.msk.f32.mxu1 %vm2590_vm1, %v2591_v19 }
 0x462   :  { %2272 = vmatprep.subr.bf16.mxu1 %v2589_v18 }
 0x51c   :  { %v2911_v15 = vpop.f32.mrb[6].mxu0 }
 0x51d   :  { %v2135_v16 = vpop.f32.mrb[7].mxu0 }
 0x524   :  { %v1143_v20 = vpop.f32.mrb[8].mxu0 }
 0x525   :  { %v1229_v21 = vmul.f32 %v1143_v20, %v2820_v43  ;;  %v2149_v22 = vpop.f32.mrb[9].mxu0 }
 0x527   :  { %v1231_v24 = vadd.f32 %v1229_v21, %v2826_v46 }
 0x529   :  { %v1233_v25 = vsel %vm491_vm6, %v1231_v24, -inf }
 0x52a   :  { %1234 = vmax.xlane.f32.xlu1 %v1233_v25 }
 0x52b   :  { %v2916_v27 = vpop.f32.mrb[12].mxu1 }
 0x52c   :  { %v2142_v28 = vpop.f32.mrb[13].mxu1 }
 0x533   :  { %v1225_v31 = vpop.f32.mrb[14].mxu1 }
 0x534   :  { %v1230_v32 = vmul.f32 %v1225_v31, %v2823_v44  ;;  %v2156_v33 = vpop.f32.mrb[15].mxu1 }
 0x536   :  { %v1232_v34 = vadd.f32 %v1230_v32, %v2832_v51 }
 0x538   :  { %v1236_v36 = vsel %vm491_vm6, %v1232_v34, -inf }
 0x539   :  { %1237 = vmax.xlane.f32.xlu0 %v1236_v36 }
 0x53b   :  { %2362 = vrot.lane.b32.xlu1 %v2784_v29, %s2597_s25 }
 0x53f   :  { %1440 = vrot.lane.b32.xlu1 %v2792_v35, %s2597_s25 }
 0x54f   :  { %2367 = vrot.lane.b32.xlu0 %v2795_v37, %s2597_s25 }
 0x553   :  { %1522 = vrot.lane.b32.xlu0 %v2807_v38, %s2597_s25 }
 0x5b7   :  { %v1235_v39 = vpop.xlane.xlu1 %1234 }
 0x5b8   :  { %vm1239_vm11 = vcmp.eq.f32.partialorder %v1235_v39, -inf }
 0x5b9   :  { %v1241_v40 = vsel %vm1239_vm11, 0.0, %v1235_v39  ;;  %v508_v39 = vsel %vm491_vm6, %v2843_v14, 0.0 }
 0x5ba   :  { %v1243_v41 = vsub.f32 %v1231_v24, %v1241_v40 }
 0x5bb   :  { %v2363_v45 = vpop.permute.xlu1 %2362 }
 0x5bc   :  { %v1245_v42 = vmul.f32 1.442695, %v1243_v41  ;;  %v2365_v47 = vunpack.i.h.bf16 %v2363_v45  ;;  %v2364_v48 = vunpack.i.l.bf16 %v2363_v45 }
 0x5be   :  { %2389 = vpow2.f32 %v1245_v42  ;;  %v2269_v52 = vpack.c.bf16 %v2365_v47, %v2364_v48  ;;  %v511_v42 = vsel %vm491_vm6, %v2851_v17, 0.0 }
 0x5bf   :  { %v1441_v57 = vpop.permute.xlu1 %1440 }
 0x5c6   :  { %v1238_v49 = vpop.xlane.xlu0 %1237 }
 0x5c7   :  { %vm1240_vm12 = vcmp.eq.f32.partialorder %v1238_v49, -inf }
 0x5c8   :  { %v2390_v50 = vpop.eup %2389  ;;  %v1242_v53 = vsel %vm1240_vm12, 0.0, %v1238_v49 }
 0x5c9   :  { %v1244_v55 = vsub.f32 %v1232_v34, %v1242_v53  ;;  %2162 = vmatmul.mubr.msk.f32.vlgmr.msra.gmra.mrb[10].mxu0 %vm491_vm6, %v2390_v50 }
 0x5ca   :  { %2271 = vmatpush3.bf16.xpose.msk.msra.mxu0 %vm2780_vm3, %v2269_v52  ;;  %2175 = vmatprep.mubr.msk.f32.mxu0 %vm2590_vm1, %v2591_v19  ;;  %v2368_v58 = vpop.permute.xlu0 %2367 }
 0x5cb   :  { %v1247_v56 = vmul.f32 1.442695, %v1244_v55  ;;  %2276 = vmatprep.subr.bf16.mxu0 %v2589_v18  ;;  %v2370_v59 = vunpack.i.h.bf16 %v2368_v58  ;;  %v2369_v60 = vunpack.i.l.bf16 %v2368_v58 }
 0x5cd   :  { %2391 = vpow2.f32 %v1247_v56  ;;  %v2273_v62 = vpack.c.bf16 %v2370_v59, %v2369_v60 }
 0x5ce   :  { %v1523_v63 = vpop.permute.xlu0 %1522 }
 0x5d1   :  { %2176 = vmatmul.mubr.msk.f32.vlgmr.msra.gmra.mrb[12].mxu0 %vm328_vm2, %v1441_v57 }
 0x5d2   :  { %2189 = vmatprep.mubr.msk.f32.mxu0 %vm2590_vm1, %v2591_v19 }
 0x5d7   :  { %v2392_v61 = vpop.eup %2391 }
 0x5d8   :  { %2169 = vmatmul.mubr.msk.f32.vlgmr.msra.gmra.mrb[16].mxu1 %vm491_vm6, %v2392_v61 }
 0x5d9   :  { %2275 = vmatpush3.bf16.xpose.msk.msra.mxu1 %vm2780_vm3, %v2273_v62  ;;  %2182 = vmatprep.mubr.msk.f32.mxu1 %vm2590_vm1, %v2591_v19 }
 0x5da   :  { %2279 = vmatprep.subr.bf16.mxu1 %v2589_v18 }
 0x5e0   :  { %2183 = vmatmul.mubr.msk.f32.vlgmr.msra.gmra.mrb[18].mxu1 %vm328_vm2, %v1523_v63 }
 0x5e1   :  { %2196 = vmatprep.mubr.msk.f32.mxu1 %vm2590_vm1, %v2591_v19 }
 0x69c   :  { %v2943_v0 = vpop.f32.mrb[10].mxu0 }
 0x69d   :  { %v2163_v1 = vpop.f32.mrb[11].mxu0 }
 0x6a4   :  { %v1518_v2 = vpop.f32.mrb[12].mxu0 }
 0x6a5   :  { %v1604_v3 = vmul.f32 %v1518_v2, %v2820_v43  ;;  %v2177_v4 = vpop.f32.mrb[13].mxu0  ;;  %v874_v43 = vsel %vm491_vm6, %v2884_v54, 0.0 }
 0x6a7   :  { %v1606_v26 = vadd.f32 %v1604_v3, %v2826_v46  ;;  %v1252_v46 = vsel %vm491_vm6, %v2392_v61, 0.0 }
 0x6a9   :  { %v1608_v5 = vsel %vm491_vm6, %v1606_v26, -inf }
 0x6aa   :  { %1609 = vmax.xlane.f32.xlu1 %v1608_v5 }
 0x6ab   :  { %v2948_v6 = vpop.f32.mrb[16].mxu1 }
 0x6ac   :  { %v2170_v18 = vpop.f32.mrb[17].mxu1 }
 0x6b3   :  { %v1600_v7 = vpop.f32.mrb[18].mxu1 }
 0x6b4   :  { %v1605_v9 = vmul.f32 %v1600_v7, %v2823_v44  ;;  %v2184_v10 = vpop.f32.mrb[19].mxu1  ;;  %v877_v44 = vsel %vm491_vm6, %v2897_v8, 0.0 }
 0x6b6   :  { %v1607_v19 = vadd.f32 %v1605_v9, %v2832_v51  ;;  %v1249_v51 = vsel %vm491_vm6, %v2390_v50, 0.0 }
 0x6b8   :  { %v1611_v11 = vsel %vm491_vm6, %v1607_v19, -inf }
 0x6b9   :  { %1612 = vmax.xlane.f32.xlu0 %v1611_v11 }
 0x6bb   :  { %2377 = vrot.lane.b32.xlu1 %v2795_v37, %s2598_s26 }
 0x6cf   :  { %2372 = vrot.lane.b32.xlu0 %v2784_v29, %s2598_s26 }
 0x6df   :  { %875 = vadd.xlane.f32.xlu1 %v874_v43 }
 0x6e3   :  { %1253 = vadd.xlane.f32.xlu1 %v1252_v46 }
 0x6ee   :  { %878 = vadd.xlane.f32.xlu0 %v877_v44 }
 0x6f2   :  { %1250 = vadd.xlane.f32.xlu0 %v1249_v51 }
 0x737   :  { %v1610_v12 = vpop.xlane.xlu1 %1609 }
 0x738   :  { %vm1614_vm13 = vcmp.eq.f32.partialorder %v1610_v12, -inf }
 0x739   :  { %v1616_v13 = vsel %vm1614_vm13, 0.0, %v1610_v12 }
 0x73a   :  { %v1618_v37 = vsub.f32 %v1606_v26, %v1616_v13 }
 0x73b   :  { %v2378_v16 = vpop.permute.xlu1 %2377 }
 0x73c   :  { %v1620_v29 = vmul.f32 1.442695, %v1618_v37  ;;  %v2380_v20 = vunpack.i.h.bf16 %v2378_v16  ;;  %v2379_v21 = vunpack.i.l.bf16 %v2378_v16 }
 0x73e   :  { %2393 = vpow2.f32 %v1620_v29  ;;  %v2280_v54 = vpack.c.bf16 %v2380_v20, %v2379_v21 }
 0x740   :  { %2281 = vmatpush3.bf16.msra.mxu1 %v2280_v54 }
 0x746   :  { %v1613_v22 = vpop.xlane.xlu0 %1612 }
 0x747   :  { %vm1615_vm14 = vcmp.eq.f32.partialorder %v1613_v22, -inf }
 0x748   :  { %v2394_v24 = vpop.eup %2393  ;;  %v1617_v25 = vsel %vm1615_vm14, 0.0, %v1613_v22 }
 0x749   :  { %v1619_v8 = vsub.f32 %v1607_v19, %v1617_v25  ;;  %v1624_v28 = vsel %vm491_vm6, %v2394_v24, 0.0 }
 0x74a   :  { %v2373_v31 = vpop.permute.xlu0 %2372  ;;  %1625 = vadd.xlane.f32.xlu0 %v1624_v28 }
 0x74b   :  { %v1622_v32 = vmul.f32 1.442695, %v1619_v8  ;;  %v2375_v33 = vunpack.i.h.bf16 %v2373_v31  ;;  %v2374_v34 = vunpack.i.l.bf16 %v2373_v31 }
 0x74d   :  { %2395 = vpow2.f32 %v1622_v32  ;;  %v2277_v36 = vpack.c.bf16 %v2375_v33, %v2374_v34 }
 0x74e   :  { %509 = vadd.xlane.f32.xlu0 %v508_v39 }
 0x74f   :  { %2278 = vmatpush3.bf16.msra.mxu0 %v2277_v36 }
 0x752   :  { %2190 = vmatmul.mubr.msk.f32.vlgmr.msra.gmra.mrb[14].mxu0 %vm491_vm6, %v2394_v24 }
 0x757   :  { %v2396_v40 = vpop.eup %2395 }
 0x758   :  { %2197 = vmatmul.mubr.msk.f32.vlgmr.msra.gmra.mrb[20].mxu1 %vm491_vm6, %v2396_v40  ;;  %v1627_v41 = vsel %vm491_vm6, %v2396_v40, 0.0  ;;  %vm1062_vm6 = vcmask 130112   ;;  %v1817_v40 = vld [vmem:[#allocation12] sm:$0xff] }
 0x759   :  { %1628 = vadd.xlane.f32.xlu1 %v1627_v41  ;;  %v1818_v41 = vld [vmem:[#allocation12 + $0x8] sm:$0xff] }
 0x75d   :  { %512 = vadd.xlane.f32.xlu1 %v511_v42 }
 0x76c   :  { %v876_v45 = vpop.xlane.xlu1 %875 }
 0x76d   :  { %2397 = vrcp.f32 %v876_v45  ;;  %vm888_vm15 = vcmp.gt.f32.partialorder %v876_v45, 0.0 }
 0x770   :  { %v1254_v47 = vpop.xlane.xlu1 %1253 }
 0x771   :  { %2399 = vrcp.f32 %v1254_v47  ;;  %vm1264_vm1 = vcmp.gt.f32.partialorder %v1254_v47, 0.0 }
 0x777   :  { %v2398_v48 = vpop.eup %2397 }
 0x778   :  { %v882_v14 = vmul.f32 %v2398_v48, %v876_v45  ;;  %v2282_v45 = vpack.c.bf16 %v1818_v41, %v1817_v40 }
 0x77a   :  { %v884_v49 = vsub.f32 2.0, %v882_v14  ;;  %2283 = vmatprep.subr.bf16.mxu0 %v2282_v45  ;;  %v1820_v14 = vld [vmem:[#allocation12 + $0x18] sm:$0xff] }
 0x77b   :  { %v2400_v50 = vpop.eup %2399  ;;  %v879_v52 = vpop.xlane.xlu0 %878  ;;  %2285 = vmatpush3.bf16.msra.mxu0 %v2282_v45 }
 0x77c   :  { %v1258_v53 = vmul.f32 %v2400_v50, %v1254_v47  ;;  %2401 = vrcp.f32 %v879_v52  ;;  %v886_v55 = vmul.f32 %v2398_v48, %v884_v49  ;;  %vm889_vm3 = vcmp.gt.f32.partialorder %v879_v52, 0.0  ;;  %v1819_v48 = vld [vmem:[#allocation12 + $0x10] sm:$0xff] }
 0x77e   :  { %v1260_v56 = vsub.f32 2.0, %v1258_v53  ;;  %v890_v57 = vsel %vm888_vm15, %v886_v55, 0.0 }
 0x77f   :  { %v1251_v58 = vpop.xlane.xlu0 %1250  ;;  %v1050_v59 = vmul.f32 %v2911_v15, %v890_v57 }
 0x780   :  { %v1262_v17 = vmul.f32 %v2400_v50, %v1260_v56  ;;  %2403 = vrcp.f32 %v1251_v58  ;;  %vm1263_vm4 = vcmp.gt.f32.partialorder %v1251_v58, 0.0 }
 0x781   :  { %1054 = vrot.lane.b32.xlu0 %v1050_v59, %s2584_s22 }
 0x782   :  { %v1266_v60 = vsel %vm1264_vm1, %v1262_v17, 0.0 }
 0x783   :  { %v1426_v61 = vmul.f32 %v2948_v6, %v1266_v60 }
 0x785   :  { %1431 = vrot.lane.b32.xlu0 %v1426_v61, %s2599_s3 }
 0x786   :  { %v2402_v62 = vpop.eup %2401 }
 0x787   :  { %v883_v63 = vmul.f32 %v2402_v62, %v879_v52  ;;  %v2286_v52 = vpack.c.bf16 %v1820_v14, %v1819_v48 }
 0x789   :  { %v885_v1 = vsub.f32 2.0, %v883_v63  ;;  %2287 = vmatprep.subr.bf16.mxu0 %v2286_v52 }
 0x78a   :  { %v2404_v2 = vpop.eup %2403  ;;  %2289 = vmatpush3.bf16.msra.mxu0 %v2286_v52 }
 0x78b   :  { %v1257_v3 = vmul.f32 %v2404_v2, %v1251_v58  ;;  %v887_v4 = vmul.f32 %v2402_v62, %v885_v1 }
 0x78d   :  { %v1259_v26 = vsub.f32 2.0, %v1257_v3  ;;  %v891_v5 = vsel %vm889_vm3, %v887_v4, 0.0  ;;  %v1991_v3 = vld [vmem:[%s3024_s8] ss:$0 sm:$0xff]  ;;  %s2601_s8 = smov [#allocation14]  }
 0x78e   :  { %v1051_v15 = vmul.f32 %v2916_v27, %v891_v5  ;;  %s1936_s17 = sshll.u32 %s2601_s8, 4  ;;  %s1937_s17 = int_to_ptr.vmem [resolvable:$true] %s1936_s17 }
 0x78f   :  { %v1261_v18 = vmul.f32 %v2404_v2, %v1259_v26  ;;  %s2549_s28 = scalar_lea.vmem %s1937_s17, 256  ;;  %p2554_p7 = scmp.lt.s32.totalorder %s1937_s17, %s1937_s17 }
 0x790   :  { %1056 = vrot.lane.b32.xlu1 %v1051_v15, %s2584_s22  ;;  %p2550_p6 = scmp.ne.s32.totalorder %s1937_s17, %s2549_s28  ;;  %p2555_p8 = scmp.lt.s32.totalorder %s2549_s28, %s2549_s28 }
 0x791   :  { %v1265_v7 = vsel %vm1263_vm4, %v1261_v18, 0.0 }
 0x792   :  { %v1425_v6 = vmul.f32 %v2943_v0, %v1265_v7  ;;  %p2556_p9 = por %p2555_p8, %p2554_p7 }
 0x794   :  { %1429 = vrot.lane.b32.xlu1 %v1425_v6, %s2599_s3  ;;  %p2557_p10 = pnand %p2556_p9, %p2550_p6 }
 0x7d7   :  { %v1626_v9 = vpop.xlane.xlu0 %1625 }
 0x7db   :  { %v510_v10 = vpop.xlane.xlu0 %509 }
 0x7dc   :  { %2405 = vrcp.f32 %v510_v10  ;;  %vm522_vm5 = vcmp.gt.f32.partialorder %v510_v10, 0.0 }
 0x7e6   :  { %v2406_v19 = vpop.eup %2405  ;;  %v2975_v11 = vpop.xlane.xlu1 %1628 }
 0x7e7   :  { %v516_v43 = vmul.f32 %v2406_v19, %v510_v10  ;;  %vm1639_vm9 = vcmp.gt.f32.partialorder %v2975_v11, 0.0 }
 0x7e9   :  { %v518_v46 = vsub.f32 2.0, %v516_v43 }
 0x7ea   :  { %v513_v44 = vpop.xlane.xlu1 %512 }
 0x7eb   :  { %v520_v51 = vmul.f32 %v2406_v19, %v518_v46  ;;  %2407 = vrcp.f32 %v513_v44  ;;  %vm523_vm7 = vcmp.gt.f32.partialorder %v513_v44, 0.0 }
 0x7ec   :  { %2409 = vrcp.f32 %v1626_v9 }
 0x7ed   :  { %v524_v27 = vsel %vm522_vm5, %v520_v51, 0.0  ;;  %2411 = vrcp.f32 %v2975_v11 }
 0x7ee   :  { %v684_v12 = vmul.f32 %v2866_v23, %v524_v27 }
 0x7f0   :  { %v686_v13 = vadd.f32 %v684_v12, %v2792_v35 }
 0x7f2   :  { %688 = vst.msk [vmem:[#allocation2] sm:$0xff] %vm328_vm2, %v686_v13 }
 0x7f3   :  { %v1055_v0 = vpop.permute.xlu0 %1054 }
 0x7f4   :  { %v1060_v37 = vadd.f32 %v1055_v0, %v2792_v35 }
 0x7f5   :  { %v2408_v16 = vpop.eup %2407 }
 0x7f6   :  { %v517_v29 = vmul.f32 %v2408_v16, %v513_v44  ;;  %1063 = vst.msk [vmem:[#allocation2] sm:$0xff] %vm1062_vm6, %v1060_v37 }
 0x7f7   :  { %v1432_v24 = vpop.permute.xlu0 %1431 }
 0x7f8   :  { %v519_v20 = vsub.f32 2.0, %v517_v29  ;;  %v1436_v28 = vadd.f32 %v1432_v24, %v2807_v38 }
 0x7fa   :  { %v521_v21 = vmul.f32 %v2408_v16, %v519_v20 }
 0x7fc   :  { %v525_v54 = vsel %vm523_vm7, %v521_v21, 0.0 }
 0x7fd   :  { %v685_v22 = vmul.f32 %v2869_v30, %v525_v54  ;;  %v2410_v30 = vpop.eup %2409 }
 0x7fe   :  { %v1632_v33 = vmul.f32 %v2410_v30, %v1626_v9  ;;  %v2412_v34 = vpop.eup %2411 }
 0x7ff   :  { %v687_v23 = vadd.f32 %v685_v22, %v2807_v38  ;;  %v1633_v39 = vmul.f32 %v2412_v34, %v2975_v11 }
 0x800   :  { %v1634_v36 = vsub.f32 2.0, %v1632_v33 }
 0x801   :  { %689 = vst.msk [vmem:[#allocation2 + $0x8] sm:$0xff] %vm328_vm2, %v687_v23  ;;  %v1635_v47 = vsub.f32 2.0, %v1633_v39  ;;  %vm1638_vm2 = vcmp.gt.f32.partialorder %v1626_v9, 0.0 }
 0x802   :  { %v1057_v25 = vpop.permute.xlu1 %1056  ;;  %v1636_v42 = vmul.f32 %v2410_v30, %v1634_v36 }
 0x803   :  { %v1061_v8 = vadd.f32 %v1057_v25, %v2807_v38  ;;  %v1637_v56 = vmul.f32 %v2412_v34, %v1635_v47 }
 0x804   :  { %v1640_v49 = vsel %vm1638_vm2, %v1636_v42, 0.0 }
 0x805   :  { %1064 = vst.msk [vmem:[#allocation2 + $0x8] sm:$0xff] %vm1062_vm6, %v1061_v8  ;;  %v1641_v57 = vsel %vm1639_vm9, %v1637_v56, 0.0 }
 0x806   :  { %v1430_v31 = vpop.permute.xlu1 %1429  ;;  %1439 = vst.msk [vmem:[#allocation2 + $0x8] sm:$0xff] %vm1437_vm8, %v1436_v28 }
 0x807   :  { %v1435_v32 = vadd.f32 %v1430_v31, %v2792_v35 }
 0x809   :  { %1438 = vst.msk [vmem:[#allocation2] sm:$0xff] %vm1437_vm8, %v1435_v32 }
 0x825   :  { %v1717_v50 = vpop.f32.mrb[14].mxu0 }
 0x826   :  { %v1800_v53 = vmul.f32 %v1717_v50, %v1640_v49  ;;  %v2191_v55 = vpop.f32.mrb[15].mxu0 }
 0x828   :  { %1804 = vrot.lane.b32.xlu1 %v1800_v53, %s2600_s12 }
 0x82b   :  { %v1796_v58 = vpop.f32.mrb[20].mxu1 }
 0x82c   :  { %v1801_v59 = vmul.f32 %v1796_v58, %v1641_v57  ;;  %v2198_v17 = vpop.f32.mrb[21].mxu1 }
 0x82e   :  { %1806 = vrot.lane.b32.xlu0 %v1801_v59, %s2600_s12 }
 0x89a   :  { %v1805_v60 = vpop.permute.xlu1 %1804 }
 0x89b   :  { %v1810_v61 = vadd.f32 %v1805_v60, %v2792_v35 }
 0x89d   :  { %1813 = vst.msk [vmem:[#allocation2] sm:$0xff] %vm1812_vm10, %v1810_v61 }
 0x8a0   :  { %v1807_v62 = vpop.permute.xlu0 %1806 }
 0x8a1   :  { %v1811_v63 = vadd.f32 %v1807_v62, %v2807_v38 }
 0x8a3   :  { %1814 = vst.msk [vmem:[#allocation2 + $0x8] sm:$0xff] %vm1812_vm10, %v1811_v63 }
 0x8a4   :  { %v1815_v1 = vld [vmem:[#allocation2] sm:$0xff] }
 0x8a5   :  { %2207 = vmatprep.mubr.msk.f32.mxu0 %vm138_vm0, %v1815_v1 }
 0x8aa   :  { %v1816_v2 = vld [vmem:[#allocation2 + $0x8] sm:$0xff] }
 0x8ab   :  { %2208 = vmatmul.mubr.msk.f32.vlgmr.msra.gmra.mrb[16].mxu0 %vm138_vm0, %v1816_v2 }
 0x97e   :  { %v2209_v4 = vpop.f32.mrb[16].mxu0 }
 0x97f   :  { %v1906_v26 = vadd.f32 %v2209_v4, %v1991_v3  ;;  %v1900_v5 = vpop.f32.mrb[17].mxu0 }
 0x980   :  { %v1901_v15 = vadd.f32 %v1991_v3, %v1900_v5 }
 0x981   :  { %v1912_v35 = vmul.f32 %v1906_v26, %v1906_v26  ;;  %v1910_v51 = vmul.f32 0.5, %v1906_v26 }
 0x982   :  { %v1911_v18 = vmul.f32 %v1901_v15, %v1901_v15  ;;  %v1909_v12 = vmul.f32 0.5, %v1901_v15 }
 0x983   :  { %v1914_v7 = vmul.f32 %v1912_v35, %v1906_v26 }
 0x984   :  { %v1913_v6 = vmul.f32 %v1911_v18, %v1901_v15 }
 0x985   :  { %v1916_v38 = vmul.f32 0.044715, %v1914_v7 }
 0x986   :  { %v1915_v9 = vmul.f32 0.044715, %v1913_v6 }
 0x987   :  { %v1918_v10 = vadd.f32 %v1916_v38, %v1906_v26 }
 0x988   :  { %v1917_v19 = vadd.f32 %v1915_v9, %v1901_v15 }
 0x989   :  { %v1920_v11 = vmul.f32 0.7978846, %v1918_v10 }
 0x98a   :  { %v1919_v43 = vmul.f32 0.7978846, %v1917_v19 }
 0x98b   :  { %2413 = vtanh.f32 %v1920_v11 }
 0x98c   :  { %2415 = vtanh.f32 %v1919_v43 }
 0x995   :  { %v2414_v46 = vpop.eup %2413 }
 0x996   :  { %v2416_v44 = vpop.eup %2415  ;;  %v1924_v27 = vadd.f32 1.0, %v2414_v46 }
 0x997   :  { %v1923_v13 = vadd.f32 1.0, %v2416_v44 }
 0x998   :  { %v1926_v0 = vmul.f32 %v1924_v27, %v1910_v51 }
 0x999   :  { %v1925_v37 = vmul.f32 %v1923_v13, %v1909_v12 }
 0x99a   :  { %v1928_v16 = vadd.f32 %v1926_v0, %v1816_v2 }
 0x99b   :  { %v1927_v29 = vadd.f32 %v1925_v37, %v1815_v1 }
 0x99c   :  { %1930 = vst.msk [vmem:[#allocation14 + $0x8] sm:$0xff] %vm138_vm0, %v1928_v16 }
 0x99d   :  { %1929 = vst.msk [vmem:[#allocation14] sm:$0xff] %vm138_vm0, %v1927_v29 }
 0x99e   :  { %2560 = shalt.err (!%p2557_p10)
}
 0x99f   :  { %s2561_s11 = scalar_lea.hbm %s3025_s9, 256 }
 0x9a0   :  { %p2562_p11 = scmp.ne.s32.totalorder %s3025_s9, %s2561_s11  ;;  %p2565_p12 = scmp.lt.u32.totalorder %s2561_s11, %s3025_s9 }
 0x9a2   :  { %p2567_p13 = pnand %p2565_p12, %p2562_p11 }
 0x9a4   :  { %2570 = shalt.err (!%p2567_p13)
}
 0x9a5   :  { %1942 = dma.vmem_to_hbm [thread:$0]  %s1937_s17, 256, %s3025_s9, [#allocation5], %s2583_s21, %s2583_s21, %s2584_s22  }
 0x9a6   :  { %2579 = dma.done.wait [#allocation5], 256  }
 0x9a7   :  { %2580 = vsyncadd [#allocation5], 4294967040 }
 0x9a8   :  { %1946 = vsyncpa [#allocation4], 1 }
 0x9a9   :  { %1947 = vsyncpa [#allocation7], 1 }
 0x9aa   :  { %1948 = vsyncpa [#allocation10], 1 }
 0x9ab   :  { %1949 = vsyncpa [#allocation13], 1 }
 0x9ac   :  { %1950 = vsyncpa [#allocation5], 1 }

</bundles_post_ra>
